<compile_context>
chip_gen: v7x
topology: tpu7x:2x2x1
jax: 0.10.0
libtpu: 0.0.40
codegen_flags: <defaults>
</compile_context>

<pallas_src>
import functools

import numpy as np
import jax
import jax.numpy as jnp
from jax import lax
from jax.experimental import pallas as pl
from jax.experimental.pallas import tpu as pltpu


def _stack_layer_kernel(x_ref, r_ref, w1_ref, wmid_ref, w5_ref, out_ref, *,
                        lb, ub, Rf, num_passes):
    R = r_ref[...]                                                     # (P, TB)
    P = R.shape[0]

    # ---- Subnetwork MLP: Linear->Tanh x5 (no bias). Input is R, not x. -----
    # Layer 1: (H,P)@(P,TB) with K=P=5 underfills the MXU; do it as P broadcast
    # FMAs on the (otherwise idle) VPU to shorten the serial MXU->tanh chain.
    w1 = w1_ref[...]                                                   # (H, P)
    h = w1[:, 0:1] * R[0:1, :]
    for k in range(1, P):
        h = h + w1[:, k:k+1] * R[k:k+1, :]
    h = jnp.tanh(h)                                                    # (H, TB)

    # Layers 2-4 (packed) and layer 5: MXU dots, explicit full-f32 precision.
    for j in range(wmid_ref.shape[0]):
        h = jnp.tanh(jnp.dot(wmid_ref[j], h,
                             preferred_element_type=jnp.float32,
                             precision=lax.Precision.HIGHEST))
    h = jnp.tanh(jnp.dot(w5_ref[...], h,
                         preferred_element_type=jnp.float32,
                         precision=lax.Precision.HIGHEST))             # (P, TB)

    # ---- Softmax over the feature (sublane) axis; exact divide because the
    # result feeds the rebalance threshold comparisons. ----
    m = jnp.max(h, axis=0, keepdims=True)
    e = jnp.exp(h - m)
    w_soft = e / jnp.sum(e, axis=0, keepdims=True)                     # (P, TB)

    # ---- rebalance(): per-column clip-and-redistribute, vectorized over batch.
    # Bounded, fully-unrolled loop; `cont` freezes columns whose do-while has
    # already exited (matches the independent per-row torch loops).
    old0 = w_soft
    new0 = jnp.clip(w_soft, lb, ub)
    cont0 = jnp.ones_like(w_soft[:1, :])                               # (1, TB)

    def body_fn(_, carry):
        old, new, cont = carry
        leftover = jnp.sum(old - new, axis=0, keepdims=True)           # (1, TB)
        mask = new != ub                                               # (P, TB)
        denom = jnp.sum(jnp.where(mask, new, 0.0), axis=0, keepdims=True)
        safe_denom = jnp.where(denom == 0.0, 1.0, denom)               # guard 0/0
        reassign = leftover * new * pl.reciprocal(safe_denom, approx=True)
        new_upd = jnp.where(mask, new + reassign, new)
        active = cont > 0.5
        new1 = jnp.where(active, new_upd, new)
        old1 = jnp.where(active, new_upd, old)
        exceed = jnp.max(jnp.where(new1 > ub, 1.0, 0.0), axis=0, keepdims=True)
        cont1 = cont * exceed                                          # column keeps looping?
        new2 = jnp.where(cont1 > 0.5, jnp.clip(new1, lb, ub), new1)    # re-clip only if looping
        return old1, new2, cont1

    _, w_reb, _ = lax.fori_loop(0, num_passes, body_fn, (old0, new0, cont0),
                                unroll=True)

    # ---- updated_state[b] = sum_p( x[b] * w_reb[p,b] * (1 + R[p,b]) * Rf ) ----
    x = x_ref[...]                                                     # (1, TB)
    out_ref[...] = jnp.sum(x * w_reb * (1.0 + R) * Rf, axis=0, keepdims=True)


def _pick_tiling(B, *, lane=128, tb_max=1024):
    """Largest lane tile (<= tb_max) that still leaves >=2 grid tiles when possible,
    so v7x's two TensorCores both get work; single-TC chips just see fewer,
    bigger (overhead-amortizing) steps."""
    Bp0 = ((B + lane - 1) // lane) * lane
    if Bp0 >= 2 * lane:
        half = ((Bp0 // 2 + lane - 1) // lane) * lane
        tb = min(tb_max, half)
    else:
        tb = Bp0
    n_tiles = (Bp0 + tb - 1) // tb
    Bp = n_tiles * tb
    return tb, n_tiles, Bp


def make_stack_layer(R, weights, *, lb, ub, Rf, tb_max=1024):
    """R: (B, P) module buffer (torch layout). weights: 5 torch (out, in) matrices.
    Returns forward(x) with x: (B,) -> (B,).  R's transpose/pad into the kernel
    layout is done ONCE here (module-init analog), not per call."""
    R = jnp.asarray(R, jnp.float32)
    B, P = R.shape
    tb, n_tiles, Bp = _pick_tiling(B, tb_max=tb_max)

    # Batch-on-lanes layout + zero padding. Padded columns are harmless:
    # tanh(W@0)=0 -> uniform softmax, rebalance no-op/guarded, x=0 -> output 0.
    R_t = jnp.pad(R.T, ((0, 0), (0, Bp - B)))

    w1, w2, w3, w4, w5 = (jnp.asarray(w, jnp.float32) for w in weights)
    w_mid = jnp.stack([w2, w3, w4])                       # (3, H, H): one input, one DMA

    if lb == 0.0 and ub > 0.0:
        # sum(softmax)=1 and lb=0 => at most floor(1/ub) entries can pin at ub.
        num_passes = min(P, int(np.floor(1.0 / ub)) + 1)
    else:
        num_passes = P                                    # conservative fallback for lb>0

    kern = functools.partial(_stack_layer_kernel, lb=float(lb), ub=float(ub),
                             Rf=float(Rf), num_passes=int(num_passes))

    call = pl.pallas_call(
        kern,
        out_shape=jax.ShapeDtypeStruct((1, Bp), jnp.float32),
        grid_spec=pltpu.PrefetchScalarGridSpec(
            num_scalar_prefetch=0,
            grid=(n_tiles,),
            in_specs=[
                pl.BlockSpec((1, tb), lambda i: (0, i)),           # x
                pl.BlockSpec((P, tb), lambda i: (0, i)),           # R
                pl.BlockSpec(w1.shape, lambda i: (0, 0)),          # W1 (VMEM-resident)
                pl.BlockSpec(w_mid.shape, lambda i: (0, 0, 0)),    # W2..W4 packed
                pl.BlockSpec(w5.shape, lambda i: (0, 0)),          # W5
            ],
            out_specs=pl.BlockSpec((1, tb), lambda i: (0, i)),
        ),
        compiler_params=pltpu.CompilerParams(
            dimension_semantics=("parallel",)),   # v7x: batch tiles shard over both TCs
    )

    def forward(x):
        x_t = jnp.pad(jnp.asarray(x, jnp.float32).reshape(1, B),
                      ((0, 0), (0, Bp - B)))
        out = call(x_t, R_t, w1, w_mid, w5)
        return out[0, :B]

    return forward


# ----------------------------- plain-numpy reference ----------------------------------
def _rebalance_np(weight, lb, ub):
    old = np.array(weight, dtype=np.float64)
    new = np.clip(old, lb, ub)
    while True:
        leftover = (old - new).sum()
        mask = new != ub
        other = new[mask]
        reassign = leftover * (other / other.sum())
        new[mask] = new[mask] + reassign
        old = new
        if not np.any(new > ub):
            break
        new = np.clip(old, lb, ub)
    return new


def _reference_forward(x, R, weights, lb, ub, Rf):
    h = np.asarray(R, np.float64)
    for w in weights:                       # torch Linear (no bias): y = x @ W.T
        h = np.tanh(h @ np.asarray(w, np.float64).T)
    e = np.exp(h - h.max(axis=1, keepdims=True))
    ws = e / e.sum(axis=1, keepdims=True)
    out = np.stack([_rebalance_np(ws[i], lb, ub) for i in range(ws.shape[0])])
    return np.array([np.sum(x[i] * out[i] * (1.0 + R[i]) * Rf) for i in range(out.shape[0])])


def _init_linear(key, fan_in, fan_out):
    # torch nn.Linear weight layout: (out, in), U(-1/sqrt(fan_in), 1/sqrt(fan_in))
    bound = 1.0 / np.sqrt(fan_in)
    return jax.random.uniform(key, (fan_out, fan_in), jnp.float32, -bound, bound)


if __name__ == "__main__":
    B, P = 256, 5                     # P = 5 is forced by nn.Linear(5, 50); 2 lane tiles
    r, Delta, Rf, lb, ub = 0.02, 1.0 / 3.0, 1.01, 0.0, 0.6

    key = jax.random.PRNGKey(0)
    k_eps, k_x, k1, k2, k3, k4, k5 = jax.random.split(key, 7)

    # Deterministic stand-in for the GBM-simulated return buffer self.R
    # TODO(synk): the module draws self.R with np.random at __init__; here it is
    # built deterministically on the host (the kernel only implements forward()).
    cov = 0.15 * jnp.eye(P) + 0.03
    Lam = jnp.linspace(0.1, 0.5, P)
    mu = r + cov @ Lam - 0.5 * jnp.diag(cov @ cov.T)                   # (P,)
    eps = jax.random.normal(k_eps, (B, P))
    R = (jnp.exp(mu * Delta + jnp.sqrt(Delta) * (eps @ cov.T)) - Rf).astype(jnp.float32)

    # Bias-free Linear weights 5->50->50->50->50->5, torch (out, in) layout
    weights = [_init_linear(k1, 5, 50), _init_linear(k2, 50, 50), _init_linear(k3, 50, 50),
               _init_linear(k4, 50, 50), _init_linear(k5, 50, 5)]

    x = jax.random.uniform(k_x, (B,), jnp.float32, 0.5, 1.5)

    forward = make_stack_layer(R, weights, lb=lb, ub=ub, Rf=Rf)
    out = jax.block_until_ready(forward(x))

    ref = _reference_forward(np.asarray(x), np.asarray(R),
                             [np.asarray(w) for w in weights], lb, ub, Rf)
    np.testing.assert_allclose(np.asarray(out), ref, rtol=2e-3, atol=2e-3)
    print("KERNEL_OK")
</pallas_src>

<mosaic_0001>
module attributes {stable_mosaic.version = 11 : i64} {
  func.func @_stack_layer_kernel(%arg0: i32, %arg1: memref<1x128xf32, #tpu.memory_space<vmem>>, %arg2: memref<5x128xf32, #tpu.memory_space<vmem>>, %arg3: memref<50x5xf32, #tpu.memory_space<vmem>>, %arg4: memref<3x50x50xf32, #tpu.memory_space<vmem>>, %arg5: memref<5x50xf32, #tpu.memory_space<vmem>>, %arg6: memref<1x128xf32, #tpu.memory_space<vmem>>) attributes {dimension_semantics = [#tpu.dimension_semantics<parallel>], iteration_bounds = array<i64: 2>, scalar_prefetch = 0 : i64, scratch_operands = 0 : i64, tpu.core_type = #tpu.core_type<tc>, window_params = [{transform_indices = @transform_0, window_bounds = array<i64: 1, 128>}, {transform_indices = @transform_1, window_bounds = array<i64: 5, 128>}, {pipeline_mode = #tpu.pipeline_mode<synchronous>, transform_indices = @transform_2, window_bounds = array<i64: 50, 5>}, {pipeline_mode = #tpu.pipeline_mode<synchronous>, transform_indices = @transform_3, window_bounds = array<i64: 3, 50, 50>}, {pipeline_mode = #tpu.pipeline_mode<synchronous>, transform_indices = @transform_4, window_bounds = array<i64: 5, 50>}, {transform_indices = @transform_5, window_bounds = array<i64: 1, 128>}]} {
    %c0 = arith.constant 0 : index
    %c0_0 = arith.constant 0 : index
    %0 = vector.load %arg2[%c0, %c0_0] : memref<5x128xf32, #tpu.memory_space<vmem>>, vector<5x128xf32>
    %c0_1 = arith.constant 0 : index
    %c0_2 = arith.constant 0 : index
    %1 = vector.load %arg3[%c0_1, %c0_2] : memref<50x5xf32, #tpu.memory_space<vmem>>, vector<50x5xf32>
    %2 = vector.extract_strided_slice %1 {offsets = [0, 0], sizes = [50, 1], strides = [1, 1]} : vector<50x5xf32> to vector<50x1xf32>
    %3 = vector.extract_strided_slice %0 {offsets = [0, 0], sizes = [1, 128], strides = [1, 1]} : vector<5x128xf32> to vector<1x128xf32>
    %4 = vector.broadcast %2 : vector<50x1xf32> to vector<50x128xf32>
    %5 = vector.broadcast %3 : vector<1x128xf32> to vector<50x128xf32>
    %6 = arith.mulf %4, %5 : vector<50x128xf32>
    %7 = vector.extract_strided_slice %1 {offsets = [0, 1], sizes = [50, 1], strides = [1, 1]} : vector<50x5xf32> to vector<50x1xf32>
    %8 = vector.extract_strided_slice %0 {offsets = [1, 0], sizes = [1, 128], strides = [1, 1]} : vector<5x128xf32> to vector<1x128xf32>
    %9 = vector.broadcast %7 : vector<50x1xf32> to vector<50x128xf32>
    %10 = vector.broadcast %8 : vector<1x128xf32> to vector<50x128xf32>
    %11 = arith.mulf %9, %10 : vector<50x128xf32>
    %12 = arith.addf %6, %11 : vector<50x128xf32>
    %13 = vector.extract_strided_slice %1 {offsets = [0, 2], sizes = [50, 1], strides = [1, 1]} : vector<50x5xf32> to vector<50x1xf32>
    %14 = vector.extract_strided_slice %0 {offsets = [2, 0], sizes = [1, 128], strides = [1, 1]} : vector<5x128xf32> to vector<1x128xf32>
    %15 = vector.broadcast %13 : vector<50x1xf32> to vector<50x128xf32>
    %16 = vector.broadcast %14 : vector<1x128xf32> to vector<50x128xf32>
    %17 = arith.mulf %15, %16 : vector<50x128xf32>
    %18 = arith.addf %12, %17 : vector<50x128xf32>
    %19 = vector.extract_strided_slice %1 {offsets = [0, 3], sizes = [50, 1], strides = [1, 1]} : vector<50x5xf32> to vector<50x1xf32>
    %20 = vector.extract_strided_slice %0 {offsets = [3, 0], sizes = [1, 128], strides = [1, 1]} : vector<5x128xf32> to vector<1x128xf32>
    %21 = vector.broadcast %19 : vector<50x1xf32> to vector<50x128xf32>
    %22 = vector.broadcast %20 : vector<1x128xf32> to vector<50x128xf32>
    %23 = arith.mulf %21, %22 : vector<50x128xf32>
    %24 = arith.addf %18, %23 : vector<50x128xf32>
    %25 = vector.extract_strided_slice %1 {offsets = [0, 4], sizes = [50, 1], strides = [1, 1]} : vector<50x5xf32> to vector<50x1xf32>
    %26 = vector.extract_strided_slice %0 {offsets = [4, 0], sizes = [1, 128], strides = [1, 1]} : vector<5x128xf32> to vector<1x128xf32>
    %27 = vector.broadcast %25 : vector<50x1xf32> to vector<50x128xf32>
    %28 = vector.broadcast %26 : vector<1x128xf32> to vector<50x128xf32>
    %29 = arith.mulf %27, %28 : vector<50x128xf32>
    %30 = arith.addf %24, %29 : vector<50x128xf32>
    %31 = math.tanh %30 : vector<50x128xf32>
    %c0_3 = arith.constant 0 : index
    %c0_4 = arith.constant 0 : index
    %c0_5 = arith.constant 0 : index
    %32 = vector.load %arg4[%c0_3, %c0_4, %c0_5] : memref<3x50x50xf32, #tpu.memory_space<vmem>>, vector<1x50x50xf32>
    %33 = vector.shape_cast %32 : vector<1x50x50xf32> to vector<50x50xf32>
    %cst = arith.constant dense<0.000000e+00> : vector<50x128xf32>
    %34 = tpu.matmul %33, %31, %cst {dimension_numbers = #tpu.dot_dimension_numbers<[1], [0], [0], [1], [0, 0, 1, 1], [], []>, precision = #tpu.contract_precision<fp32>} : vector<50x50xf32>, vector<50x128xf32>, vector<50x128xf32> -> vector<50x128xf32>
    %35 = math.tanh %34 : vector<50x128xf32>
    %c1 = arith.constant 1 : index
    %c0_6 = arith.constant 0 : index
    %c0_7 = arith.constant 0 : index
    %36 = vector.load %arg4[%c1, %c0_6, %c0_7] : memref<3x50x50xf32, #tpu.memory_space<vmem>>, vector<1x50x50xf32>
    %37 = vector.shape_cast %36 : vector<1x50x50xf32> to vector<50x50xf32>
    %cst_8 = arith.constant dense<0.000000e+00> : vector<50x128xf32>
    %38 = tpu.matmul %37, %35, %cst_8 {dimension_numbers = #tpu.dot_dimension_numbers<[1], [0], [0], [1], [0, 0, 1, 1], [], []>, precision = #tpu.contract_precision<fp32>} : vector<50x50xf32>, vector<50x128xf32>, vector<50x128xf32> -> vector<50x128xf32>
    %39 = math.tanh %38 : vector<50x128xf32>
    %c2 = arith.constant 2 : index
    %c0_9 = arith.constant 0 : index
    %c0_10 = arith.constant 0 : index
    %40 = vector.load %arg4[%c2, %c0_9, %c0_10] : memref<3x50x50xf32, #tpu.memory_space<vmem>>, vector<1x50x50xf32>
    %41 = vector.shape_cast %40 : vector<1x50x50xf32> to vector<50x50xf32>
    %cst_11 = arith.constant dense<0.000000e+00> : vector<50x128xf32>
    %42 = tpu.matmul %41, %39, %cst_11 {dimension_numbers = #tpu.dot_dimension_numbers<[1], [0], [0], [1], [0, 0, 1, 1], [], []>, precision = #tpu.contract_precision<fp32>} : vector<50x50xf32>, vector<50x128xf32>, vector<50x128xf32> -> vector<50x128xf32>
    %43 = math.tanh %42 : vector<50x128xf32>
    %c0_12 = arith.constant 0 : index
    %c0_13 = arith.constant 0 : index
    %44 = vector.load %arg5[%c0_12, %c0_13] : memref<5x50xf32, #tpu.memory_space<vmem>>, vector<5x50xf32>
    %cst_14 = arith.constant dense<0.000000e+00> : vector<5x128xf32>
    %45 = tpu.matmul %44, %43, %cst_14 {dimension_numbers = #tpu.dot_dimension_numbers<[1], [0], [0], [1], [0, 0, 1, 1], [], []>, precision = #tpu.contract_precision<fp32>} : vector<5x50xf32>, vector<50x128xf32>, vector<5x128xf32> -> vector<5x128xf32>
    %46 = math.tanh %45 : vector<5x128xf32>
    %cst_15 = arith.constant dense<0xFF800000> : vector<128xf32>
    %47 = vector.multi_reduction <maximumf>, %46, %cst_15 [0] : vector<5x128xf32> to vector<128xf32>
    %48 = vector.shape_cast %47 : vector<128xf32> to vector<1x128xf32>
    %49 = vector.broadcast %48 : vector<1x128xf32> to vector<5x128xf32>
    %50 = arith.subf %46, %49 : vector<5x128xf32>
    %51 = math.exp %50 : vector<5x128xf32>
    %cst_16 = arith.constant dense<0.000000e+00> : vector<128xf32>
    %52 = vector.multi_reduction <add>, %51, %cst_16 [0] : vector<5x128xf32> to vector<128xf32>
    %53 = vector.shape_cast %52 : vector<128xf32> to vector<1x128xf32>
    %54 = vector.broadcast %53 : vector<1x128xf32> to vector<5x128xf32>
    %55 = arith.divf %51, %54 : vector<5x128xf32>
    %cst_17 = arith.constant 0.000000e+00 : f32
    %cst_18 = arith.constant 6.000000e-01 : f32
    %56 = vector.broadcast %cst_17 : f32 to vector<5x128xf32>
    %57 = arith.maximumf %56, %55 : vector<5x128xf32>
    %58 = vector.broadcast %cst_18 : f32 to vector<5x128xf32>
    %59 = arith.minimumf %58, %57 : vector<5x128xf32>
    %cst_19 = arith.constant 1.000000e+00 : f32
    %60 = vector.broadcast %cst_19 : f32 to vector<1x128xf32>
    %c0_i32 = arith.constant 0 : i32
    %61 = arith.subf %55, %59 : vector<5x128xf32>
    %cst_20 = arith.constant dense<0.000000e+00> : vector<128xf32>
    %62 = vector.multi_reduction <add>, %61, %cst_20 [0] : vector<5x128xf32> to vector<128xf32>
    %63 = vector.shape_cast %62 : vector<128xf32> to vector<1x128xf32>
    %cst_21 = arith.constant 6.000000e-01 : f32
    %64 = vector.broadcast %cst_21 : f32 to vector<5x128xf32>
    %65 = arith.cmpf one, %59, %64 : vector<5x128xf32>
    %cst_22 = arith.constant 0.000000e+00 : f32
    %66 = vector.broadcast %cst_22 : f32 to vector<5x128xf32>
    %67 = arith.select %65, %59, %66 : vector<5x128xi1>, vector<5x128xf32>
    %cst_23 = arith.constant dense<0.000000e+00> : vector<128xf32>
    %68 = vector.multi_reduction <add>, %67, %cst_23 [0] : vector<5x128xf32> to vector<128xf32>
    %69 = vector.shape_cast %68 : vector<128xf32> to vector<1x128xf32>
    %cst_24 = arith.constant 0.000000e+00 : f32
    %70 = vector.broadcast %cst_24 : f32 to vector<1x128xf32>
    %71 = arith.cmpf oeq, %69, %70 : vector<1x128xf32>
    %cst_25 = arith.constant 1.000000e+00 : f32
    %72 = vector.broadcast %cst_25 : f32 to vector<1x128xf32>
    %73 = arith.select %71, %72, %69 : vector<1x128xi1>, vector<1x128xf32>
    %74 = vector.broadcast %63 : vector<1x128xf32> to vector<5x128xf32>
    %75 = arith.mulf %74, %59 : vector<5x128xf32>
    %76 = tpu.reciprocal %73 {approx = true} : vector<1x128xf32> -> vector<1x128xf32>
    %77 = vector.broadcast %76 : vector<1x128xf32> to vector<5x128xf32>
    %78 = arith.mulf %75, %77 : vector<5x128xf32>
    %79 = arith.addf %59, %78 : vector<5x128xf32>
    %80 = arith.select %65, %79, %59 : vector<5x128xi1>, vector<5x128xf32>
    %cst_26 = arith.constant 5.000000e-01 : f32
    %81 = vector.broadcast %cst_26 : f32 to vector<1x128xf32>
    %82 = arith.cmpf ogt, %60, %81 : vector<1x128xf32>
    %83 = vector.shape_cast %82 : vector<1x128xi1> to vector<1x128xi1>
    %84 = vector.broadcast %83 : vector<1x128xi1> to vector<5x128xi1>
    %85 = arith.select %84, %80, %59 : vector<5x128xi1>, vector<5x128xf32>
    %86 = vector.shape_cast %82 : vector<1x128xi1> to vector<1x128xi1>
    %87 = vector.broadcast %86 : vector<1x128xi1> to vector<5x128xi1>
    %88 = arith.select %87, %80, %55 : vector<5x128xi1>, vector<5x128xf32>
    %cst_27 = arith.constant 6.000000e-01 : f32
    %89 = vector.broadcast %cst_27 : f32 to vector<5x128xf32>
    %90 = arith.cmpf ogt, %85, %89 : vector<5x128xf32>
    %cst_28 = arith.constant 1.000000e+00 : f32
    %cst_29 = arith.constant 0.000000e+00 : f32
    %91 = vector.broadcast %cst_28 : f32 to vector<5x128xf32>
    %92 = vector.broadcast %cst_29 : f32 to vector<5x128xf32>
    %93 = arith.select %90, %91, %92 : vector<5x128xi1>, vector<5x128xf32>
    %cst_30 = arith.constant dense<0xFF800000> : vector<128xf32>
    %94 = vector.multi_reduction <maximumf>, %93, %cst_30 [0] : vector<5x128xf32> to vector<128xf32>
    %95 = vector.shape_cast %94 : vector<128xf32> to vector<1x128xf32>
    %96 = arith.mulf %60, %95 : vector<1x128xf32>
    %cst_31 = arith.constant 5.000000e-01 : f32
    %97 = vector.broadcast %cst_31 : f32 to vector<1x128xf32>
    %98 = arith.cmpf ogt, %96, %97 : vector<1x128xf32>
    %cst_32 = arith.constant 0.000000e+00 : f32
    %cst_33 = arith.constant 6.000000e-01 : f32
    %99 = vector.broadcast %cst_32 : f32 to vector<5x128xf32>
    %100 = arith.maximumf %99, %85 : vector<5x128xf32>
    %101 = vector.broadcast %cst_33 : f32 to vector<5x128xf32>
    %102 = arith.minimumf %101, %100 : vector<5x128xf32>
    %103 = vector.shape_cast %98 : vector<1x128xi1> to vector<1x128xi1>
    %104 = vector.broadcast %103 : vector<1x128xi1> to vector<5x128xi1>
    %105 = arith.select %104, %102, %85 : vector<5x128xi1>, vector<5x128xf32>
    %c1_i32 = arith.constant 1 : i32
    %106 = arith.subf %88, %105 : vector<5x128xf32>
    %cst_34 = arith.constant dense<0.000000e+00> : vector<128xf32>
    %107 = vector.multi_reduction <add>, %106, %cst_34 [0] : vector<5x128xf32> to vector<128xf32>
    %108 = vector.shape_cast %107 : vector<128xf32> to vector<1x128xf32>
    %cst_35 = arith.constant 6.000000e-01 : f32
    %109 = vector.broadcast %cst_35 : f32 to vector<5x128xf32>
    %110 = arith.cmpf one, %105, %109 : vector<5x128xf32>
    %cst_36 = arith.constant 0.000000e+00 : f32
    %111 = vector.broadcast %cst_36 : f32 to vector<5x128xf32>
    %112 = arith.select %110, %105, %111 : vector<5x128xi1>, vector<5x128xf32>
    %cst_37 = arith.constant dense<0.000000e+00> : vector<128xf32>
    %113 = vector.multi_reduction <add>, %112, %cst_37 [0] : vector<5x128xf32> to vector<128xf32>
    %114 = vector.shape_cast %113 : vector<128xf32> to vector<1x128xf32>
    %cst_38 = arith.constant 0.000000e+00 : f32
    %115 = vector.broadcast %cst_38 : f32 to vector<1x128xf32>
    %116 = arith.cmpf oeq, %114, %115 : vector<1x128xf32>
    %cst_39 = arith.constant 1.000000e+00 : f32
    %117 = vector.broadcast %cst_39 : f32 to vector<1x128xf32>
    %118 = arith.select %116, %117, %114 : vector<1x128xi1>, vector<1x128xf32>
    %119 = vector.broadcast %108 : vector<1x128xf32> to vector<5x128xf32>
    %120 = arith.mulf %119, %105 : vector<5x128xf32>
    %121 = tpu.reciprocal %118 {approx = true} : vector<1x128xf32> -> vector<1x128xf32>
    %122 = vector.broadcast %121 : vector<1x128xf32> to vector<5x128xf32>
    %123 = arith.mulf %120, %122 : vector<5x128xf32>
    %124 = arith.addf %105, %123 : vector<5x128xf32>
    %125 = arith.select %110, %124, %105 : vector<5x128xi1>, vector<5x128xf32>
    %cst_40 = arith.constant 5.000000e-01 : f32
    %126 = vector.broadcast %cst_40 : f32 to vector<1x128xf32>
    %127 = arith.cmpf ogt, %96, %126 : vector<1x128xf32>
    %128 = vector.shape_cast %127 : vector<1x128xi1> to vector<1x128xi1>
    %129 = vector.broadcast %128 : vector<1x128xi1> to vector<5x128xi1>
    %130 = arith.select %129, %125, %105 : vector<5x128xi1>, vector<5x128xf32>
    %131 = vector.shape_cast %127 : vector<1x128xi1> to vector<1x128xi1>
    %132 = vector.broadcast %131 : vector<1x128xi1> to vector<5x128xi1>
    %133 = arith.select %132, %125, %88 : vector<5x128xi1>, vector<5x128xf32>
    %cst_41 = arith.constant 6.000000e-01 : f32
    %134 = vector.broadcast %cst_41 : f32 to vector<5x128xf32>
    %135 = arith.cmpf ogt, %130, %134 : vector<5x128xf32>
    %cst_42 = arith.constant 1.000000e+00 : f32
    %cst_43 = arith.constant 0.000000e+00 : f32
    %136 = vector.broadcast %cst_42 : f32 to vector<5x128xf32>
    %137 = vector.broadcast %cst_43 : f32 to vector<5x128xf32>
    %138 = arith.select %135, %136, %137 : vector<5x128xi1>, vector<5x128xf32>
    %cst_44 = arith.constant dense<0xFF800000> : vector<128xf32>
    %139 = vector.multi_reduction <maximumf>, %138, %cst_44 [0] : vector<5x128xf32> to vector<128xf32>
    %140 = vector.shape_cast %139 : vector<128xf32> to vector<1x128xf32>
    %141 = arith.mulf %96, %140 : vector<1x128xf32>
    %cst_45 = arith.constant 5.000000e-01 : f32
    %142 = vector.broadcast %cst_45 : f32 to vector<1x128xf32>
    %143 = arith.cmpf ogt, %141, %142 : vector<1x128xf32>
    %cst_46 = arith.constant 0.000000e+00 : f32
    %cst_47 = arith.constant 6.000000e-01 : f32
    %144 = vector.broadcast %cst_46 : f32 to vector<5x128xf32>
    %145 = arith.maximumf %144, %130 : vector<5x128xf32>
    %146 = vector.broadcast %cst_47 : f32 to vector<5x128xf32>
    %147 = arith.minimumf %146, %145 : vector<5x128xf32>
    %148 = vector.shape_cast %143 : vector<1x128xi1> to vector<1x128xi1>
    %149 = vector.broadcast %148 : vector<1x128xi1> to vector<5x128xi1>
    %150 = arith.select %149, %147, %130 : vector<5x128xi1>, vector<5x128xf32>
    %c0_48 = arith.constant 0 : index
    %c0_49 = arith.constant 0 : index
    %151 = vector.load %arg1[%c0_48, %c0_49] : memref<1x128xf32, #tpu.memory_space<vmem>>, vector<1x128xf32>
    %152 = vector.broadcast %151 : vector<1x128xf32> to vector<5x128xf32>
    %153 = arith.mulf %152, %150 : vector<5x128xf32>
    %cst_50 = arith.constant 1.000000e+00 : f32
    %154 = vector.broadcast %cst_50 : f32 to vector<5x128xf32>
    %155 = arith.addf %154, %0 : vector<5x128xf32>
    %156 = arith.mulf %153, %155 : vector<5x128xf32>
    %cst_51 = arith.constant 1.010000e+00 : f32
    %157 = vector.broadcast %cst_51 : f32 to vector<5x128xf32>
    %158 = arith.mulf %156, %157 : vector<5x128xf32>
    %cst_52 = arith.constant dense<0.000000e+00> : vector<128xf32>
    %159 = vector.multi_reduction <add>, %158, %cst_52 [0] : vector<5x128xf32> to vector<128xf32>
    %160 = vector.shape_cast %159 : vector<128xf32> to vector<1x128xf32>
    %c0_53 = arith.constant 0 : index
    %c0_54 = arith.constant 0 : index
    %161 = vector.load %arg6[%c0_53, %c0_54] : memref<1x128xf32, #tpu.memory_space<vmem>>, vector<1x128xf32>
    tpu.vector_store %arg6[%c0_53, %c0_54], %160 {strides = array<i32>} : memref<1x128xf32, #tpu.memory_space<vmem>>, vector<1x128xf32>,
    return
  }
  func.func @transform_0(%arg0: i32) -> (i32, i32) {
    %c0_i32 = arith.constant 0 : i32
    %c0_i32_0 = arith.constant 0 : i32
    return %c0_i32, %arg0 : i32, i32
  }
  func.func @transform_1(%arg0: i32) -> (i32, i32) {
    %c0_i32 = arith.constant 0 : i32
    %c0_i32_0 = arith.constant 0 : i32
    return %c0_i32, %arg0 : i32, i32
  }
  func.func @transform_2(%arg0: i32) -> (i32, i32) {
    %c0_i32 = arith.constant 0 : i32
    %c0_i32_0 = arith.constant 0 : i32
    %c0_i32_1 = arith.constant 0 : i32
    return %c0_i32, %c0_i32_0 : i32, i32
  }
  func.func @transform_3(%arg0: i32) -> (i32, i32, i32) {
    %c0_i32 = arith.constant 0 : i32
    %c0_i32_0 = arith.constant 0 : i32
    %c0_i32_1 = arith.constant 0 : i32
    %c0_i32_2 = arith.constant 0 : i32
    return %c0_i32, %c0_i32_0, %c0_i32_1 : i32, i32, i32
  }
  func.func @transform_4(%arg0: i32) -> (i32, i32) {
    %c0_i32 = arith.constant 0 : i32
    %c0_i32_0 = arith.constant 0 : i32
    %c0_i32_1 = arith.constant 0 : i32
    return %c0_i32, %c0_i32_0 : i32, i32
  }
  func.func @transform_5(%arg0: i32) -> (i32, i32) {
    %c0_i32 = arith.constant 0 : i32
    %c0_i32_0 = arith.constant 0 : i32
    return %c0_i32, %arg0 : i32, i32
  }
}

</mosaic_0001>

<bundles_post_ra>
// kernel: tpu_custom_call.1
= control target key start
LH: loop header
LB: loop body
LE: loop exit
PB: predicated region body
PF: predicated region fallthrough
CT: control target
= control target key end

     0   :  { %10 = vsyncpa [#allocation3], 0  ;;  %s6701_s0 = inlined_call_operand.vmem [shape: f32[1,256], index: 0, kind: input, shape index: {}]   ;;  %s6702_s1 = inlined_call_operand.vmem [shape: f32[5,256], index: 1, kind: input, shape index: {}]   ;;  %s6703_s2 = inlined_call_operand.vmem [shape: f32[50,5], index: 2, kind: input, shape index: {}]   ;;  %s6704_s3 = inlined_call_operand.hbm [shape: f32[3,50,50], index: 3, kind: input, shape index: {}]   ;;  %s6705_s4 = inlined_call_operand.vmem [shape: f32[5,50], index: 4, kind: input, shape index: {}]   ;;  %s6706_s5 = inlined_call_operand.hbm [shape: f32[1,256], index: 5, kind: output, shape index: {}]  }
   0x1   :  { %11 = vsyncpa [#allocation4], 0 }
   0x2   :  { %13 = vsyncpa [#allocation4 + $0x1], 0  ;;  %s5467_s18 = smov 0   ;;  %s5469_s19 = smov 0  }
   0x3   :  { %s5471_s20 = smov 0   ;;  %s5473_s21 = smov 0  }
   0x4 LB: > { %s5488_s22 = sadd.s32 4294967295, %s5423_s21   ;;  %s3704_s23 = sadd.s32 4294967294, %s5423_s21   ;;  %s5423_s21 = sphi %s5473_s21, %s6722_s21   ;;  %s5419_s20 = sphi %s5471_s20, %s6721_s20   ;;  %s5415_s19 = sphi %s5469_s19, %s6720_s19   ;;  %s5411_s18 = sphi %s5467_s18, %s6719_s18  }
   0x5   : > { %s5492_s24 = sadd.s32 1, %s5423_s21   ;;  %s141_s25 = sadd.s32 1, %s5419_s20 }
   0x6   : > { %s138_s26 = ssub.s32 %s5423_s21, %s5492_s24  ;;  %p151_p0 = scmp.ne.s32.totalorder %s5419_s20, %s5415_s19 }
   0x7   : > { %p139_p1 = scmp.eq.s32.totalorder %s138_s26, 0  ;;  %p152_p2 = scmp.eq.s32.totalorder %s5488_s22, 1 }
   0x8   : > { %p157_p3 = scmp.ne.s32.totalorder %s5415_s19, %s5411_s18  ;;  %p158_p4 = scmp.eq.s32.totalorder %s3704_s23, 1 }
   0x9   : > { %s5503_s27 = scalar_select %p139_p1, %s5419_s20, %s141_s25  }
   0xa   : > { %p5505_p5 = por %p152_p2, %p151_p0  ;;  %p5509_p6 = por %p158_p4, %p157_p3 }
   0xb   : > { %p3705_p7 = scmp.ge.s32.totalorder %s5423_s21, 1  ;;  %p165_p8 = scmp.lt.s32.totalorder %s5423_s21, 3 }
   0xc   : > { %s6710_s28 = scalar_select %p5505_p5, 1, 0 }
   0xd   : > { %s6711_s29 = scalar_select %p5509_p6, 1, 0 }
   0xe   : > { %p6707_p9 = scmp.eq.s32.totalorder %s5488_s22, 0  ;;  %p5516_p10 = pnand %p3705_p7, %p165_p8 }
   0xf   : > { %s5425_s6 = smov [#allocation2]   ;;  %s5329_s11 = scalar_lea.hbm %s6704_s3, 2688 }
  0x10   : > { %s6712_s30 = scalar_select %p5516_p10, 1, 0 }
  0x11   : > { %s180_s7 = sshll.u32 %s5425_s6, 4  ;;  %p5186_p11 = pneg %p5516_p10  ;;  %s181_s7 = int_to_ptr.vmem [resolvable:$true] %s180_s7 }
  0x12   : > { %p5330_p13 = scmp.ne.s32.totalorder %s6704_s3, %s5329_s11  ;;  %p5336_p3 = scmp.lt.u32.totalorder %s5329_s11, %s6704_s3 }
  0x13   : > { %p5524_p12 = pnand %p6707_p9, %p5186_p11 }
  0x15   : > { %p5331_p0 = pneg %p5524_p12 }
  0x17   : > { %p5332_p1 = pnand %p5331_p0, %p5330_p13 }
  0x19   : > { %p5333_p2 = pneg %p5332_p1 }
  0x1b   : > { %p5338_p4 = pnand %p5336_p3, %p5333_p2 }
  0x1d   : > { %5341 = shalt.err (!%p5338_p4)
}
  0x1e   : > { %s5342_s16 = scalar_lea.vmem %s181_s7, 2688  ;;  %p5350_p9 = scmp.lt.s32.totalorder %s181_s7, %s181_s7 }
  0x1f   : > { %p5343_p7 = scmp.ne.s32.totalorder %s181_s7, %s5342_s16  ;;  %p5351_p6 = scmp.lt.s32.totalorder %s5342_s16, %s5342_s16 }
  0x21   : > { %p5345_p8 = pnand %p5343_p7, %p5331_p0  ;;  %p5352_p5 = por %p5351_p6, %p5350_p9 }
  0x23   : > { %p5346_p11 = pneg %p5345_p8 }
  0x25   : > { %p5353_p10 = pnand %p5352_p5, %p5346_p11 }
  0x27   : > { %5356 = shalt.err (!%p5353_p10)
}
  0x28   : > { %s5426_s17 = smov 128   ;;  %s5427_s23 = smov 8  }
  0x29   : > { %5189 = dma.hbm_to_vmem [thread:$0]  (!%p5524_p12), %s6704_s3, 2688, %s181_s7, [#allocation3], %s5426_s17, %s5426_s17, %s5427_s23  }
  0x2a   : > { %p6714_p13 = scmp.ne.s32.totalorder %s6712_s30, 0 }
  0x2b   : > { %p6715_p1 = scmp.eq.s32.totalorder (!%p6714_p13), %s5488_s22, 0 }
  0x2c   : > { %212 = sbr.rel (%p6714_p13) target bundleno = 1940 (0x794), region = 40 }
  0x33   : > { %5402 = dma.done.wait (%p6715_p1), [#allocation3], 2688   ;;  %p6716_p0 = pmov %p6715_p1 }
  0x34   : > { %v5428_v0 = vmov 3   ;;  %v5429_v1 = vmov 1   ;;  %v249_v2 = vld [vmem:[%s6703_s2] sm:$0xff]  ;;  %v250_v3 = vld [vmem:[%s6703_s2 + $0x8] sm:$0xff]  ;;  %v5430_v5 = vmov 2   ;;  %v252_v6 = vld [vmem:[%s6703_s2 + $0x18] sm:$0xff]  ;;  %v291_v20 = vlaneseq }
  0x35   : > { %5404 = vsyncadd (%p6716_p0), [#allocation3], 4294964608  ;;  %5244 = vset.pattern.permute.xlu0 %v5428_v0  ;;  %5240 = vset.pattern.permute.xlu1 %v5429_v1  ;;  %v254_v4 = vld [vmem:[%s6703_s2 + $0x28] sm:$0xff]  ;;  %v251_v7 = vld [vmem:[%s6703_s2 + $0x10] sm:$0xff]  ;;  %v5431_v8 = vmov 0   ;;  %v5432_v11 = vmov 4  }
  0x36   : > { %395 = vperm.xlu0 %5244, %v249_v2   ;;  %303 = vperm.xlu1 %5240, %v249_v2   ;;  %v253_v9 = vld [vmem:[%s6703_s2 + $0x20] sm:$0xff]  ;;  %v255_v10 = vld [vmem:[%s6703_s2 + $0x30] sm:$0x3]  ;;  %v5433_v12 = vmov 0.0|0.0   ;;  %vm5434_vm0 = vmmov 0   ;;  %v5435_v15 = vmov 0.0  }
  0x37   : > { %4747 = vmatprep.subr.bf16.mxu1 %v5433_v12  ;;  %4756 = vmatprep.subr.bf16.mxu0 %v5433_v12  ;;  %p241_p5 = scmp.lt.s32.totalorder %s5488_s22, 1  ;;  %v292_v23 = vshrl.u32 %v291_v20, 7  ;;  %vm500_vm1 = vcmask 408576   ;;  %vm522_vm2 = vcmask 1041408   ;;  %vm3489_vm3 = vcmask 1044480   ;;  %s239_s13 = sand.u32 1, %s5415_s19  }
  0x38   : > { %4064 = vmatprep.mubr.msk.f32.mxu0 %vm5434_vm0, %v5435_v15  ;;  %4029 = vmatprep.mubr.msk.f32.mxu1 %vm5434_vm0, %v5435_v15  ;;  %s3712_s14 = sshll.u32 %s5488_s22, 4  ;;  %s240_s15 = scalar_lea.vmem [#allocation5], %s239_s13 }
  0x39   : > { %s5586_s25 = scalar_select %p241_p5, %s5488_s22, 1  ;;  %v332_v26 = vsub.s32 1, %v292_v23  ;;  %v293_v27 = vsub.s32 0, %v292_v23  ;;  %v378_v32 = vsub.s32 2, %v292_v23  ;;  %v424_v34 = vsub.s32 3, %v292_v23 }
  0x3a   : > { %5250 = vset.pattern.permute.xlu0 %v5429_v1  ;;  %307 = vperm.xlu1 %5240, %v250_v3   ;;  %v470_v44 = vsub.s32 4, %v292_v23  ;;  %s3628_s16 = sshll.u32 %s240_s15, 4  ;;  %p6717_p9 = scmp.ne.s32.totalorder %s6710_s28, 0  ;;  %s6661_s16 = int_to_ptr.vmem [resolvable:$true] %s3628_s16 }
  0x3b   : > { %323 = vperm.xlu0 %5250, %v254_v4   ;;  %s3710_s26 = sshll.u32 %s5586_s25, 3  ;;  %s243_s12 = scalar_lea.vmem %s6701_s0, %s5586_s25 }
  0x3c   : > { %s5596_s7 = scalar_lea.vmem %s6702_s1, %s3710_s26  ;;  %s6659_s25 = scalar_lea.hbm %s6706_s5, %s3712_s14 }
  0x3d   : > { %v248_v28 = vld [vmem:[%s5596_s7] sm:$0x1f]  ;;  %s3616_s26 = scalar_lea.sflag [#allocation4], %s239_s13  ;;  %s5357_s6 = scalar_lea.vmem %s6661_s16, 16 }
  0x3e   : > { %5241 = vset.pattern.permute.xlu1 %v5430_v5  ;;  %v5601_v31 = vrot.slane %v248_v28, %v332_v26  ;;  %v5603_v33 = vrot.slane %v248_v28, %v293_v27  ;;  %v5607_v39 = vrot.slane %v248_v28, %v378_v32  ;;  %v5609_v40 = vrot.slane %v248_v28, %v424_v34  ;;  %p5358_p6 = scmp.ne.s32.totalorder %s6661_s16, %s5357_s6  ;;  %s5436_s22 = smov [#allocation5]  }
  0x3f   : > { %5251 = vset.pattern.permute.xlu0 %v5430_v5  ;;  %353 = vperm.xlu1 %5241, %v250_v3   ;;  %v5615_v50 = vrot.slane %v248_v28, %v470_v44  ;;  %s5361_s8 = sshll.u32 %s5436_s22, 4  ;;  %s5362_s8 = int_to_ptr.vmem [resolvable:$false] %s5361_s8 }
  0x40   : > { %349 = vperm.xlu0 %5251, %v249_v2   ;;  %p5359_p10 = pnand %p5358_p6, %p6717_p9  ;;  %p5364_p2 = scmp.lt.s32.totalorder %s6661_s16, %s5362_s8 }
  0x42   : > { %p5360_p12 = pneg %p5359_p10 }
  0x43   : > { %5242 = vset.pattern.permute.xlu1 %v5431_v8 }
  0x44   : > { %361 = vperm.xlu0 %5251, %v252_v6   ;;  %268 = vperm.xlu1 %5242, %v251_v7  }
  0x48   : > { %365 = vperm.xlu0 %5251, %v253_v9   ;;  %5243 = vset.pattern.permute.xlu1 %v5429_v1 }
  0x49   : > { %311 = vperm.xlu1 %5243, %v251_v7  }
  0x4c   : > { %5253 = vset.pattern.permute.xlu0 %v5431_v8 }
  0x4d   : > { %258 = vperm.xlu0 %5253, %v249_v2   ;;  %315 = vperm.xlu1 %5243, %v252_v6  }
  0x51   : > { %263 = vperm.xlu0 %5253, %v250_v3   ;;  %5245 = vset.pattern.permute.xlu1 %v5428_v0 }
  0x52   : > { %399 = vperm.xlu1 %5245, %v250_v3  }
  0x55   : > { %273 = vperm.xlu0 %5253, %v252_v6  }
  0x56   : > { %5246 = vset.pattern.permute.xlu1 %v5430_v5 }
  0x57   : > { %357 = vperm.xlu1 %5246, %v251_v7  }
  0x59   : > { %278 = vperm.xlu0 %5253, %v253_v9  }
  0x5b   : > { %5247 = vset.pattern.permute.xlu1 %v5432_v11 }
  0x5c   : > { %441 = vperm.xlu1 %5247, %v249_v2  }
  0x5d   : > { %288 = vperm.xlu0 %5253, %v255_v10  }
  0x60   : > { %445 = vperm.xlu1 %5247, %v250_v3  }
  0x61   : > { %5257 = vset.pattern.permute.xlu0 %v5432_v11 }
  0x62   : > { %453 = vperm.xlu0 %5257, %v252_v6  }
  0x64   : > { %5248 = vset.pattern.permute.xlu1 %v5431_v8 }
  0x65   : > { %283 = vperm.xlu1 %5248, %v254_v4  }
  0x66   : > { %461 = vperm.xlu0 %5257, %v254_v4  }
  0x69   : > { %5249 = vset.pattern.permute.xlu1 %v5429_v1 }
  0x6a   : > { %319 = vperm.xlu1 %5249, %v253_v9   ;;  %465 = vperm.xlu0 %5257, %v255_v10  }
  0x6e   : > { %5252 = vset.pattern.permute.xlu1 %v5428_v0 }
  0x6f   : > { %403 = vperm.xlu1 %5252, %v251_v7  }
  0x73   : > { %407 = vperm.xlu1 %5252, %v252_v6  }
  0x77   : > { %5254 = vset.pattern.permute.xlu1 %v5430_v5 }
  0x78   : > { %369 = vperm.xlu1 %5254, %v254_v4  }
  0x7c   : > { %5255 = vset.pattern.permute.xlu1 %v5432_v11 }
  0x7d   : > { %449 = vperm.xlu1 %5255, %v251_v7  }
  0x81   : > { %5256 = vset.pattern.permute.xlu1 %v5428_v0 }
  0x82   : > { %411 = vperm.xlu1 %5256, %v253_v9  }
  0x86   : > { %415 = vperm.xlu1 %5256, %v254_v4  }
  0x8a   : > { %5258 = vset.pattern.permute.xlu1 %v5429_v1 }
  0x8b   : > { %327 = vperm.xlu1 %5258, %v255_v10  }
  0x8f   : > { %5259 = vset.pattern.permute.xlu1 %v5432_v11 }
  0x90   : > { %457 = vperm.xlu1 %5259, %v253_v9  }
  0x94   : > { %5260 = vset.pattern.permute.xlu1 %v5430_v5 }
  0x95   : > { %373 = vperm.xlu1 %5260, %v255_v10  }
  0x99   : > { %5261 = vset.pattern.permute.xlu1 %v5428_v0 }
  0x9a   : > { %419 = vperm.xlu1 %5261, %v255_v10  }
  0xb5   : > { %v304_v13 = vpop.permute.xlu1 %303  ;;  %v396_v14 = vpop.permute.xlu0 %395 }
  0xb6   : > { %v334_v38 = vmul.f32 %v5601_v31, %v304_v13  ;;  %v426_v47 = vmul.f32 %v5609_v40, %v396_v14 }
  0xb9   : > { %v308_v16 = vpop.permute.xlu1 %307 }
  0xba   : > { %v5582_v17 = vpop.permute.xlu0 %323  ;;  %v335_v45 = vmul.f32 %v5601_v31, %v308_v16 }
  0xbe   : > { %v354_v18 = vpop.permute.xlu1 %353 }
  0xbf   : > { %v350_v19 = vpop.permute.xlu0 %349  ;;  %v381_v51 = vmul.f32 %v5607_v39, %v354_v18 }
  0xc0   : > { %v380_v41 = vmul.f32 %v5607_v39, %v350_v19 }
  0xc3   : > { %v5588_v21 = vpop.permute.xlu1 %268  ;;  %v362_v22 = vpop.permute.xlu0 %361 }
  0xc4   : > { %v383_v9 = vmul.f32 %v5607_v39, %v362_v22 }
  0xc7   : > { %v5591_v24 = vpop.permute.xlu0 %365 }
  0xc8   : > { %v5598_v25 = vpop.permute.xlu1 %311 }
  0xcc   : > { %v259_v29 = vpop.permute.xlu0 %258  ;;  %v316_v30 = vpop.permute.xlu1 %315 }
  0xcd   : > { %v295_v35 = vmul.f32 %v5603_v33, %v259_v29  ;;  %v337_v6 = vmul.f32 %v5601_v31, %v316_v30  ;;  %v336_v30 = vmul.f32 %v5601_v31, %v5598_v25 }
  0xcf   : > { %v341_v42 = vadd.f32 %v334_v38, %v295_v35 }
  0xd0   : > { %v264_v36 = vpop.permute.xlu0 %263 }
  0xd1   : > { %v400_v37 = vpop.permute.xlu1 %399  ;;  %v296_v43 = vmul.f32 %v5603_v33, %v264_v36  ;;  %v387_v48 = vadd.f32 %v380_v41, %v341_v42  ;;  %v297_v36 = vmul.f32 %v5603_v33, %v5588_v21 }
  0xd2   : > { %v427_v56 = vmul.f32 %v5609_v40, %v400_v37 }
  0xd3   : > { %v342_v49 = vadd.f32 %v335_v45, %v296_v43  ;;  %v433_v54 = vadd.f32 %v426_v47, %v387_v48  ;;  %v343_v44 = vadd.f32 %v336_v30, %v297_v36 }
  0xd4   : > { %v274_v61 = vpop.permute.xlu0 %273 }
  0xd5   : > { %v388_v53 = vadd.f32 %v381_v51, %v342_v49  ;;  %v298_v4 = vmul.f32 %v5603_v33, %v274_v61 }
  0xd6   : > { %v358_v46 = vpop.permute.xlu1 %357 }
  0xd7   : > { %v434_v59 = vadd.f32 %v427_v56, %v388_v53  ;;  %v344_v10 = vadd.f32 %v337_v6, %v298_v4  ;;  %v382_v37 = vmul.f32 %v5607_v39, %v358_v46  ;;  %v339_v46 = vmul.f32 %v5601_v31, %v5582_v17 }
  0xd8   : > { %v279_v0 = vpop.permute.xlu0 %278 }
  0xd9   : > { %v390_v23 = vadd.f32 %v383_v9, %v344_v10  ;;  %v389_v25 = vadd.f32 %v382_v37, %v343_v44 }
  0xdb   : > { %v442_v52 = vpop.permute.xlu1 %441 }
  0xdc   : > { %v472_v55 = vmul.f32 %v5615_v50, %v442_v52  ;;  %v5621_v2 = vpop.permute.xlu0 %288 }
  0xde   : > { %v479_v57 = vadd.f32 %v472_v55, %v433_v54 }
  0xdf   : > { %v446_v58 = vpop.permute.xlu1 %445 }
  0xe0   : > { %5262 = vtanh.f32 %v479_v57  ;;  %v473_v60 = vmul.f32 %v5615_v50, %v446_v58 }
  0xe1   : > { %v454_v14 = vpop.permute.xlu0 %453 }
  0xe2   : > { %v480_v62 = vadd.f32 %v473_v60, %v434_v59  ;;  %v475_v26 = vmul.f32 %v5615_v50, %v454_v14  ;;  %v299_v59 = vmul.f32 %v5603_v33, %v279_v0 }
  0xe4   : > { %5264 = vtanh.f32 %v480_v62  ;;  %v284_v63 = vpop.permute.xlu1 %283 }
  0xe5   : > { %v300_v52 = vmul.f32 %v5603_v33, %v284_v63  ;;  %v462_v56 = vpop.permute.xlu0 %461 }
  0xe6   : > { %v477_v17 = vmul.f32 %v5615_v50, %v462_v56 }
  0xe7   : > { %v346_v57 = vadd.f32 %v339_v46, %v300_v52 }
  0xe9   : > { %v320_v1 = vpop.permute.xlu1 %319 }
  0xea   : > { %v5263_v3 = vpop.eup %5262  ;;  %v338_v61 = vmul.f32 %v5601_v31, %v320_v1 }
  0xeb   : > { %v527_v5 = vand.u32 4294901760, %v5263_v3 }
  0xec   : > { %v345_v6 = vadd.f32 %v338_v61, %v299_v59 }
  0xed   : > { %v5625_v7 = vsub.f32 %v5263_v3, %v527_v5 }
  0xee   : > { %v5265_v8 = vpop.eup %5264  ;;  %v404_v11 = vpop.permute.xlu1 %403 }
  0xef   : > { %v530_v13 = vand.u32 4294901760, %v5265_v8  ;;  %v671_v16 = vand.u32 4294901760, %v5625_v7  ;;  %v428_v45 = vmul.f32 %v5609_v40, %v404_v11 }
  0xf1   : > { %v5629_v18 = vpack.c.bf16 %v530_v13, %v527_v5  ;;  %v5631_v19 = vsub.f32 %v5265_v8, %v530_v13  ;;  %v672_v22 = vsub.f32 %v5625_v7, %v671_v16  ;;  %v435_v49 = vadd.f32 %v428_v45, %v389_v25 }
  0xf2   : > { %v408_v20 = vpop.permute.xlu1 %407  ;;  %v384_v5 = vmul.f32 %v5607_v39, %v5591_v24 }
  0xf3   : > { %v429_v27 = vmul.f32 %v5609_v40, %v408_v20  ;;  %4749 = vmatpush3.bf16.msra.mxu1 %v5629_v18  ;;  %v678_v28 = vand.u32 4294901760, %v5631_v19  ;;  %v4766_v29 = vpack.c.bf16 %v5631_v19, %v5625_v7  ;;  %v673_v42 = vand.u32 4294901760, %v672_v22 }
  0xf4   : > { %4750 = vmatprep.subr.bf16.mxu1 %v5433_v12  ;;  %v391_v13 = vadd.f32 %v384_v5, %v345_v6 }
  0xf5   : > { %v436_v32 = vadd.f32 %v429_v27, %v390_v23  ;;  %v679_v34 = vsub.f32 %v5631_v19, %v678_v28  ;;  %v5644_v35 = vpack.c.bf16 %v678_v28, %v671_v16 }
  0xf7   : > { %v482_v38 = vadd.f32 %v475_v26, %v436_v32  ;;  %v370_v41 = vpop.permute.xlu1 %369  ;;  %v680_v43 = vand.u32 4294901760, %v679_v34 }
  0xf8   : > { %v385_v54 = vmul.f32 %v5607_v39, %v370_v41  ;;  %v301_v41 = vmul.f32 %v5603_v33, %v5621_v2 }
  0xf9   : > { %5266 = vtanh.f32 %v482_v38  ;;  %v4757_v47 = vpack.c.bf16 %v680_v43, %v673_v42 }
  0xfa   : > { %v392_v62 = vadd.f32 %v385_v54, %v346_v57  ;;  %v494_v54 = vld [vmem:[#allocation2 + $0x8] sm:$0xff] }
  0xfb   : > { %4758 = vmatpush3.bf16.msra.mxu0 %v4757_v47  ;;  %v466_v47 = vpop.permute.xlu0 %465  ;;  %v505_v57 = vsel %vm500_vm1, %v494_v54, 0 }
  0xfc   : > { %v450_v48 = vpop.permute.xlu1 %449  ;;  %4759 = vmatprep.subr.bf16.mxu0 %v5433_v12  ;;  %v5704_v61 = vand.u32 4294901760, %v505_v57 }
  0xfd   : > { %v474_v51 = vmul.f32 %v5615_v50, %v450_v48 }
  0xfe   : > { %v5710_v6 = vsub.f32 %v505_v57, %v5704_v61 }
  0xff   : > { %v481_v21 = vadd.f32 %v474_v51, %v435_v49  ;;  %v493_v51 = vld [vmem:[#allocation2] sm:$0xff] }
 0x100   : > { %v502_v46 = vsel %vm500_vm1, %v493_v51, 0  ;;  %v499_v51 = vld [vmem:[#allocation2 + $0x30] sm:$0x3] }
 0x101   : > { %5268 = vtanh.f32 %v481_v21  ;;  %v412_v53 = vpop.permute.xlu1 %411  ;;  %v478_v21 = vmul.f32 %v5615_v50, %v466_v47 }
 0x102   : > { %v430_v0 = vmul.f32 %v5609_v40, %v412_v53 }
 0x103   : > { %v5267_v55 = vpop.eup %5266 }
 0x104   : > { %v536_v58 = vand.u32 4294901760, %v5267_v55  ;;  %v437_v23 = vadd.f32 %v430_v0, %v391_v13  ;;  %v496_v0 = vld [vmem:[#allocation2 + $0x18] sm:$0xff] }
 0x105   : > { %v416_v60 = vpop.permute.xlu1 %415 }
 0x106   : > { %v431_v3 = vmul.f32 %v5609_v40, %v416_v60  ;;  %v5660_v63 = vsub.f32 %v5267_v55, %v536_v58 }
 0x108   : > { %v438_v4 = vadd.f32 %v431_v3, %v392_v62  ;;  %v692_v1 = vand.u32 4294901760, %v5660_v63  ;;  %v495_v62 = vld [vmem:[#allocation2 + $0x10] sm:$0xff] }
 0x10a   : > { %v484_v8 = vadd.f32 %v477_v17, %v438_v4  ;;  %v328_v9 = vpop.permute.xlu1 %327  ;;  %v693_v27 = vsub.f32 %v5660_v63, %v692_v1 }
 0x10b   : > { %v5269_v10 = vpop.eup %5268  ;;  %v340_v32 = vmul.f32 %v5601_v31, %v328_v9  ;;  %v508_v9 = vsel %vm500_vm1, %v495_v62, 0 }
 0x10c   : > { %5270 = vtanh.f32 %v484_v8  ;;  %v533_v11 = vand.u32 4294901760, %v5269_v10  ;;  %v694_v37 = vand.u32 4294901760, %v693_v27  ;;  %v511_v27 = vsel %vm500_vm1, %v496_v0, 0 }
 0x10d   : > { %v347_v45 = vadd.f32 %v340_v32, %v301_v41 }
 0x10e   : > { %v5666_v14 = vpack.c.bf16 %v536_v58, %v533_v11  ;;  %v5668_v16 = vsub.f32 %v5269_v10, %v533_v11  ;;  %v610_v11 = vand.u32 4294901760, %v5710_v6 }
 0x10f   : > { %v458_v20 = vpop.permute.xlu1 %457 }
 0x110   : > { %v476_v26 = vmul.f32 %v5615_v50, %v458_v20  ;;  %4752 = vmatpush3.bf16.msra.mxu1 %v5666_v14  ;;  %v685_v24 = vand.u32 4294901760, %v5668_v16  ;;  %v5718_v20 = vand.u32 4294901760, %v508_v9  ;;  %v4769_v7 = vpack.c.bf16 %v5660_v63, %v5668_v16 }
 0x111   : > { %4753 = vmatprep.subr.bf16.mxu1 %v5433_v12 }
 0x112   : > { %v483_v22 = vadd.f32 %v476_v26, %v437_v23  ;;  %v686_v28 = vsub.f32 %v5668_v16, %v685_v24  ;;  %v5676_v30 = vpack.c.bf16 %v692_v1, %v685_v24  ;;  %v611_v26 = vsub.f32 %v5710_v6, %v610_v11 }
 0x114   : > { %5272 = vtanh.f32 %v483_v22  ;;  %v374_v34 = vpop.permute.xlu1 %373  ;;  %v687_v36 = vand.u32 4294901760, %v686_v28  ;;  %v497_v22 = vld [vmem:[#allocation2 + $0x20] sm:$0xff]  ;;  %v5728_v28 = vsub.f32 %v508_v9, %v5718_v20 }
 0x115   : > { %v386_v42 = vmul.f32 %v5607_v39, %v374_v34  ;;  %v5734_v34 = vand.u32 4294901760, %v511_v27  ;;  %v514_v41 = vsel %vm500_vm1, %v497_v22, 0 }
 0x116   : > { %v5271_v38 = vpop.eup %5270  ;;  %v4760_v43 = vpack.c.bf16 %v694_v37, %v687_v36  ;;  %v620_v36 = vand.u32 4294901760, %v5728_v28  ;;  %v612_v37 = vand.u32 4294901760, %v611_v26  ;;  %v5751_v47 = vand.u32 4294901760, %v514_v41 }
 0x117   : > { %v542_v44 = vand.u32 4294901760, %v5271_v38  ;;  %v393_v48 = vadd.f32 %v386_v42, %v347_v45  ;;  %v498_v42 = vld [vmem:[#allocation2 + $0x28] sm:$0xff] }
 0x118   : > { %4761 = vmatpush3.bf16.msra.mxu0 %v4760_v43  ;;  %v5743_v43 = vsub.f32 %v511_v27, %v5734_v34 }
 0x119   : > { %v420_v25 = vpop.permute.xlu1 %419  ;;  %4762 = vmatprep.subr.bf16.mxu0 %v5433_v12  ;;  %v5684_v49 = vsub.f32 %v5271_v38, %v542_v44 }
 0x11a   : > { %v432_v31 = vmul.f32 %v5609_v40, %v420_v25  ;;  %v5693_v40 = vand.u32 4294901760, %v502_v46  ;;  %v630_v25 = vand.u32 4294901760, %v5743_v43 }
 0x11b   : > { %v706_v53 = vand.u32 4294901760, %v5684_v49 }
 0x11c   : > { %v439_v33 = vadd.f32 %v432_v31, %v393_v48  ;;  %v5700_v59 = vsub.f32 %v502_v46, %v5693_v40  ;;  %v517_v31 = vsel %vm500_vm1, %v498_v42, 0 }
 0x11d   : > { %v707_v58 = vsub.f32 %v5684_v49, %v706_v53 }
 0x11e   : > { %v5273_v2 = vpop.eup %5272  ;;  %v485_v39 = vadd.f32 %v478_v21, %v439_v33  ;;  %v600_v3 = vand.u32 4294901760, %v5700_v59  ;;  %v5758_v21 = vsub.f32 %v514_v41, %v5751_v47 }
 0x11f   : > { %v539_v52 = vand.u32 4294901760, %v5273_v2  ;;  %v708_v5 = vand.u32 4294901760, %v707_v58 }
 0x120   : > { %5274 = vtanh.f32 %v485_v39  ;;  %v601_v8 = vsub.f32 %v5700_v59, %v600_v3  ;;  %v5765_v39 = vand.u32 4294901760, %v517_v31  ;;  %v640_v46 = vand.u32 4294901760, %v5758_v21 }
 0x121   : > { %v5689_v55 = vpack.c.bf16 %v542_v44, %v539_v52  ;;  %v5691_v56 = vsub.f32 %v5273_v2, %v539_v52  ;;  %v621_v44 = vsub.f32 %v5728_v28, %v620_v36  ;;  %v631_v2 = vsub.f32 %v5743_v43, %v630_v25 }
 0x122   : > { %v602_v23 = vand.u32 4294901760, %v601_v8  ;;  %v520_v52 = vsel %vm500_vm1, %v499_v51, 0  ;;  %v641_v57 = vsub.f32 %v5758_v21, %v640_v46 }
 0x123   : > { %4755 = vmatpush3.bf16.msra.mxu1 %v5689_v55  ;;  %v699_v50 = vand.u32 4294901760, %v5691_v56  ;;  %v622_v33 = vand.u32 4294901760, %v621_v44  ;;  %v632_v54 = vand.u32 4294901760, %v631_v2  ;;  %v5786_v19 = vand.u32 4294901760, %v520_v52  ;;  %v1317_v2 = vld [vmem:[#allocation2 + $0x40] sm:$0xff] }
 0x124   : > { %4027 = vmatprep.subr.mxu1 %v5435_v15  ;;  %v642_v63 = vand.u32 4294901760, %v641_v57  ;;  %v4772_v58 = vpack.c.bf16 %v5684_v49, %v5691_v56 }
 0x125   : > { %v700_v60 = vsub.f32 %v5691_v56, %v699_v50  ;;  %v5707_v17 = vpack.c.bf16 %v706_v53, %v699_v50  ;;  %v5776_v53 = vsub.f32 %v517_v31, %v5765_v39  ;;  %v5793_v50 = vsub.f32 %v520_v52, %v5786_v19 }
 0x127   : > { %v701_v4 = vand.u32 4294901760, %v700_v60  ;;  %v660_v60 = vand.u32 4294901760, %v5793_v50 }
 0x129   : > { %v4763_v10 = vpack.c.bf16 %v708_v5, %v701_v4  ;;  %v661_v4 = vsub.f32 %v5793_v50, %v660_v60 }
 0x12a   : > { %v5275_v1 = vpop.eup %5274 }
 0x12b   : > { %4764 = vmatpush3.bf16.msra.mxu0 %v4763_v10  ;;  %v524_v13 = vsel %vm522_vm2, %v5275_v1, 0  ;;  %v662_v49 = vand.u32 4294901760, %v661_v4 }
 0x12c   : > { %v5723_v24 = vand.u32 4294901760, %v524_v13  ;;  %4062 = vmatprep.subr.mxu0 %v5435_v15 }
 0x12e   : > { %4028 = vmatpush3.msra.mxu1 %v5723_v24  ;;  %v5732_v32 = vsub.f32 %v524_v13, %v5723_v24 }
 0x12f   : > { %4030 = vmatmul.mubr.f32.vlgmr.msra.gmra.mrb[0].mxu1 %v602_v23  ;;  %4801 = vmatprep.subr.bf16.mxu1 %v5433_v12 }
 0x130   : > { %v713_v38 = vand.u32 4294901760, %v5732_v32  ;;  %4032 = vmatprep.mubr.msk.f32.mxu1 %vm5434_vm0, %v5435_v15 }
 0x132   : > { %v714_v45 = vsub.f32 %v5732_v32, %v713_v38 }
 0x133   : > { %4033 = vmatmul.mubr.f32.gmra.mrb[2].mxu1 %v612_v37 }
 0x134   : > { %v715_v48 = vand.u32 4294901760, %v714_v45  ;;  %4035 = vmatprep.mubr.msk.f32.mxu1 %vm5434_vm0, %v5435_v15 }
 0x136   : > { %4063 = vmatpush3.msra.mxu0 %v715_v48 }
 0x137   : > { %4065 = vmatmul.mubr.f32.vlgmr.msra.gmra.mrb[0].mxu0 %v5693_v40  ;;  %4765 = vmatprep.subr.bf16.mxu0 %v5433_v12 }
 0x138   : > { %4767 = vmatpush3.bf16.msra.mxu0 %v4766_v29  ;;  %4067 = vmatprep.mubr.msk.f32.mxu0 %vm5434_vm0, %v5435_v15  ;;  %v650_v29 = vand.u32 4294901760, %v5776_v53 }
 0x139   : > { %4768 = vmatprep.subr.bf16.mxu0 %v5433_v12  ;;  %4036 = vmatmul.mubr.f32.gmra.mrb[4].mxu1 %v622_v33 }
 0x13a   : > { %4038 = vmatprep.mubr.msk.f32.mxu1 %vm5434_vm0, %v5435_v15  ;;  %v651_v16 = vsub.f32 %v5776_v53, %v650_v29 }
 0x13b   : > { %4068 = vmatmul.mubr.f32.gmra.mrb[2].mxu0 %v5704_v61 }
 0x13c   : > { %4770 = vmatpush3.bf16.msra.mxu0 %v4769_v7  ;;  %4070 = vmatprep.mubr.msk.f32.mxu0 %vm5434_vm0, %v5435_v15  ;;  %v652_v62 = vand.u32 4294901760, %v651_v16 }
 0x13d   : > { %4771 = vmatprep.subr.bf16.mxu0 %v5433_v12  ;;  %4039 = vmatmul.mubr.f32.gmra.mrb[6].mxu1 %v632_v54 }
 0x13e   : > { %4041 = vmatprep.mubr.msk.f32.mxu1 %vm5434_vm0, %v5435_v15 }
 0x13f   : > { %4071 = vmatmul.mubr.f32.gmra.mrb[4].mxu0 %v5718_v20 }
 0x140   : > { %4773 = vmatpush3.bf16.msra.mxu0 %v4772_v58  ;;  %4073 = vmatprep.mubr.msk.f32.mxu0 %vm5434_vm0, %v5435_v15 }
 0x141   : > { %4097 = vmatprep.subr.mxu0 %v5435_v15  ;;  %4042 = vmatmul.mubr.f32.gmra.mrb[8].mxu1 %v642_v63 }
 0x142   : > { %4044 = vmatprep.mubr.msk.f32.mxu1 %vm5434_vm0, %v5435_v15 }
 0x143   : > { %4074 = vmatmul.mubr.f32.gmra.mrb[6].mxu0 %v5734_v34 }
 0x144   : > { %4098 = vmatpush3.msra.mxu0 %v5732_v32  ;;  %4076 = vmatprep.mubr.msk.f32.mxu0 %vm5434_vm0, %v5435_v15 }
 0x145   : > { %4774 = vmatprep.subr.bf16.mxu0 %v5433_v12  ;;  %4045 = vmatmul.mubr.f32.gmra.mrb[10].mxu1 %v652_v62 }
 0x146   : > { %4047 = vmatprep.mubr.msk.f32.mxu1 %vm5434_vm0, %v5435_v15 }
 0x147   : > { %4077 = vmatmul.mubr.f32.gmra.mrb[8].mxu0 %v5751_v47 }
 0x148   : > { %4079 = vmatprep.mubr.msk.f32.mxu0 %vm5434_vm0, %v5435_v15 }
 0x149   : > { %4048 = vmatmul.mubr.f32.gmra.mrb[12].mxu1 %v662_v49 }
 0x14a   : > { %4239 = vmatprep.mubr.msk.f32.mxu1 %vm5434_vm0, %v5435_v15 }
 0x14b   : > { %4080 = vmatmul.mubr.f32.gmra.mrb[10].mxu0 %v5765_v39 }
 0x14c   : > { %4082 = vmatprep.mubr.msk.f32.mxu0 %vm5434_vm0, %v5435_v15 }
 0x14f   : > { %4083 = vmatmul.mubr.f32.gmra.mrb[12].mxu0 %v5786_v19 }
 0x150   : > { %4099 = vmatprep.mubr.msk.f32.mxu0 %vm5434_vm0, %v5435_v15 }
 0x153   : > { %4100 = vmatmul.mubr.f32.vlgmr.msra.gmra.mrb[0].mxu0 %v5700_v59 }
 0x154   : > { %4776 = vmatpush3.bf16.msra.mxu0 %v5629_v18  ;;  %4102 = vmatprep.mubr.msk.f32.mxu0 %vm5434_vm0, %v5435_v15 }
 0x155   : > { %4777 = vmatprep.subr.bf16.mxu0 %v5433_v12 }
 0x157   : > { %4103 = vmatmul.mubr.f32.gmra.mrb[2].mxu0 %v5710_v6 }
 0x158   : > { %4779 = vmatpush3.bf16.msra.mxu0 %v5666_v14  ;;  %4105 = vmatprep.mubr.msk.f32.mxu0 %vm5434_vm0, %v5435_v15 }
 0x159   : > { %4780 = vmatprep.subr.bf16.mxu0 %v5433_v12 }
 0x15b   : > { %4106 = vmatmul.mubr.f32.gmra.mrb[4].mxu0 %v5728_v28 }
 0x15c   : > { %4782 = vmatpush3.bf16.msra.mxu0 %v5689_v55  ;;  %4108 = vmatprep.mubr.msk.f32.mxu0 %vm5434_vm0, %v5435_v15 }
 0x15d   : > { %4132 = vmatprep.subr.mxu0 %v5435_v15 }
 0x15f   : > { %4109 = vmatmul.mubr.f32.gmra.mrb[6].mxu0 %v5743_v43 }
 0x160   : > { %4133 = vmatpush3.msra.mxu0 %v5723_v24  ;;  %4111 = vmatprep.mubr.msk.f32.mxu0 %vm5434_vm0, %v5435_v15 }
 0x161   : > { %4783 = vmatprep.subr.bf16.mxu0 %v5433_v12 }
 0x163   : > { %4112 = vmatmul.mubr.f32.gmra.mrb[8].mxu0 %v5758_v21 }
 0x164   : > { %4114 = vmatprep.mubr.msk.f32.mxu0 %vm5434_vm0, %v5435_v15 }
 0x167   : > { %4115 = vmatmul.mubr.f32.gmra.mrb[10].mxu0 %v5776_v53  ;;  %v1318_v53 = vld [vmem:[#allocation2 + $0x48] sm:$0xff] }
 0x168   : > { %4117 = vmatprep.mubr.msk.f32.mxu0 %vm5434_vm0, %v5435_v15  ;;  %v1330_v62 = vsel %vm500_vm1, %v1318_v53, 0 }
 0x16b   : > { %4118 = vmatmul.mubr.f32.gmra.mrb[12].mxu0 %v5793_v50 }
 0x16c   : > { %4134 = vmatprep.mubr.msk.f32.mxu0 %vm5434_vm0, %v5435_v15 }
 0x16f   : > { %4135 = vmatmul.mubr.f32.vlgmr.msra.gmra.mrb[0].mxu0 %v600_v3 }
 0x170   : > { %4785 = vmatpush3.bf16.msra.mxu0 %v5644_v35  ;;  %4137 = vmatprep.mubr.msk.f32.mxu0 %vm5434_vm0, %v5435_v15 }
 0x171   : > { %4786 = vmatprep.subr.bf16.mxu0 %v5433_v12 }
 0x173   : > { %4138 = vmatmul.mubr.f32.gmra.mrb[2].mxu0 %v610_v11 }
 0x174   : > { %4788 = vmatpush3.bf16.msra.mxu0 %v5676_v30  ;;  %4140 = vmatprep.mubr.msk.f32.mxu0 %vm5434_vm0, %v5435_v15 }
 0x175   : > { %4789 = vmatprep.subr.bf16.mxu0 %v5433_v12 }
 0x177   : > { %4141 = vmatmul.mubr.f32.gmra.mrb[4].mxu0 %v620_v36 }
 0x178   : > { %4791 = vmatpush3.bf16.msra.mxu0 %v5707_v17  ;;  %4143 = vmatprep.mubr.msk.f32.mxu0 %vm5434_vm0, %v5435_v15 }
 0x179   : > { %4167 = vmatprep.subr.mxu0 %v5435_v15 }
 0x17b   : > { %4144 = vmatmul.mubr.f32.gmra.mrb[6].mxu0 %v630_v25 }
 0x17c   : > { %4168 = vmatpush3.msra.mxu0 %v713_v38  ;;  %4146 = vmatprep.mubr.msk.f32.mxu0 %vm5434_vm0, %v5435_v15 }
 0x17d   : > { %4792 = vmatprep.subr.bf16.mxu0 %v5433_v12 }
 0x17f   : > { %4147 = vmatmul.mubr.f32.gmra.mrb[8].mxu0 %v640_v46 }
 0x180   : > { %4149 = vmatprep.mubr.msk.f32.mxu0 %vm5434_vm0, %v5435_v15 }
 0x183   : > { %4150 = vmatmul.mubr.f32.gmra.mrb[10].mxu0 %v650_v29  ;;  %v1327_v29 = vsel %vm500_vm1, %v1317_v2, 0 }
 0x184   : > { %4152 = vmatprep.mubr.msk.f32.mxu0 %vm5434_vm0, %v5435_v15 }
 0x187   : > { %4153 = vmatmul.mubr.f32.gmra.mrb[12].mxu0 %v660_v60 }
 0x188   : > { %4169 = vmatprep.mubr.msk.f32.mxu0 %vm5434_vm0, %v5435_v15 }
 0x18b   : > { %4170 = vmatmul.mubr.f32.vlgmr.msra.gmra.mrb[0].mxu0 %v5693_v40 }
 0x18c   : > { %4794 = vmatpush3.bf16.msra.mxu0 %v5629_v18  ;;  %4172 = vmatprep.mubr.msk.f32.mxu0 %vm5434_vm0, %v5435_v15 }
 0x18d   : > { %4795 = vmatprep.subr.bf16.mxu0 %v5433_v12 }
 0x18f   : > { %4173 = vmatmul.mubr.f32.gmra.mrb[2].mxu0 %v5704_v61 }
 0x190   : > { %4797 = vmatpush3.bf16.msra.mxu0 %v5666_v14  ;;  %4175 = vmatprep.mubr.msk.f32.mxu0 %vm5434_vm0, %v5435_v15 }
 0x191   : > { %4798 = vmatprep.subr.bf16.mxu0 %v5433_v12 }
 0x193   : > { %4176 = vmatmul.mubr.f32.gmra.mrb[4].mxu0 %v5718_v20 }
 0x194   : > { %4800 = vmatpush3.bf16.msra.mxu0 %v5689_v55  ;;  %4178 = vmatprep.mubr.msk.f32.mxu0 %vm5434_vm0, %v5435_v15 }
 0x195   : > { %4202 = vmatprep.subr.mxu0 %v5435_v15 }
 0x197   : > { %4179 = vmatmul.mubr.f32.gmra.mrb[6].mxu0 %v5734_v34 }
 0x198   : > { %4203 = vmatpush3.msra.mxu0 %v5723_v24  ;;  %4181 = vmatprep.mubr.msk.f32.mxu0 %vm5434_vm0, %v5435_v15 }
 0x199   : > { %4855 = vmatprep.subr.bf16.mxu0 %v5433_v12 }
 0x19b   : > { %4182 = vmatmul.mubr.f32.gmra.mrb[8].mxu0 %v5751_v47 }
 0x19c   : > { %4184 = vmatprep.mubr.msk.f32.mxu0 %vm5434_vm0, %v5435_v15 }
 0x19f   : > { %4185 = vmatmul.mubr.f32.gmra.mrb[10].mxu0 %v5765_v39 }
 0x1a0   : > { %4187 = vmatprep.mubr.msk.f32.mxu0 %vm5434_vm0, %v5435_v15 }
 0x1a3   : > { %4188 = vmatmul.mubr.f32.gmra.mrb[12].mxu0 %v5786_v19 }
 0x1a4   : > { %4204 = vmatprep.mubr.msk.f32.mxu0 %vm5434_vm0, %v5435_v15 }
 0x1a7   : > { %4205 = vmatmul.mubr.f32.vlgmr.msra.gmra.mrb[0].mxu0 %v5693_v40 }
 0x1a8   : > { %4207 = vmatprep.mubr.msk.f32.mxu0 %vm5434_vm0, %v5435_v15 }
 0x1ab   : > { %4208 = vmatmul.mubr.f32.gmra.mrb[2].mxu0 %v5704_v61 }
 0x1ac   : > { %4210 = vmatprep.mubr.msk.f32.mxu0 %vm5434_vm0, %v5435_v15 }
 0x1af   : > { %4211 = vmatmul.mubr.f32.gmra.mrb[4].mxu0 %v5718_v20 }
 0x1b0   : > { %4213 = vmatprep.mubr.msk.f32.mxu0 %vm5434_vm0, %v5435_v15 }
 0x1b3   : > { %4214 = vmatmul.mubr.f32.gmra.mrb[6].mxu0 %v5734_v34  ;;  %v1316_v34 = vld [vmem:[#allocation2 + $0x38] sm:$0xff] }
 0x1b4   : > { %4216 = vmatprep.mubr.msk.f32.mxu0 %vm5434_vm0, %v5435_v15  ;;  %v1324_v44 = vsel %vm500_vm1, %v1316_v34, 0 }
 0x1b5   : > { %v5954_v33 = vand.u32 4294901760, %v1324_v44 }
 0x1b7   : > { %4217 = vmatmul.mubr.f32.gmra.mrb[8].mxu0 %v5751_v47  ;;  %v5969_v60 = vsub.f32 %v1324_v44, %v5954_v33 }
 0x1b8   : > { %4219 = vmatprep.mubr.msk.f32.mxu0 %vm5434_vm0, %v5435_v15 }
 0x1bb   : > { %4220 = vmatmul.mubr.f32.gmra.mrb[10].mxu0 %v5765_v39 }
 0x1bc   : > { %4222 = vmatprep.mubr.msk.f32.mxu0 %vm5434_vm0, %v5435_v15 }
 0x1bf   : > { %4223 = vmatmul.mubr.f32.gmra.mrb[12].mxu0 %v5786_v19 }
 0x1c0   : > { %4449 = vmatprep.mubr.msk.f32.mxu0 %vm5434_vm0, %v5435_v15 }
 0x202   : > { %v604_v18 = vpop.f32.mrb[0].mxu1 }
 0x203   : > { %v4031_v35 = vpop.f32.mrb[1].mxu1 }
 0x206   : > { %v614_v14 = vpop.f32.mrb[2].mxu1 }
 0x207   : > { %v4034_v30 = vpop.f32.mrb[3].mxu1 }
 0x20c   : > { %v624_v55 = vpop.f32.mrb[4].mxu1 }
 0x20d   : > { %v4037_v56 = vpop.f32.mrb[5].mxu1 }
 0x210   : > { %v634_v40 = vpop.f32.mrb[6].mxu1 }
 0x211   : > { %v4040_v59 = vpop.f32.mrb[7].mxu1 }
 0x212   : > { %v1421_v59 = vand.u32 4294901760, %v5969_v60 }
 0x214   : > { %v644_v61 = vpop.f32.mrb[8].mxu1 }
 0x215   : > { %v4043_v3 = vpop.f32.mrb[9].mxu1 }
 0x216   : > { %v1319_v3 = vld [vmem:[#allocation2 + $0x50] sm:$0xff] }
 0x218   : > { %v654_v17 = vpop.f32.mrb[10].mxu1 }
 0x219   : > { %v4046_v5 = vpop.f32.mrb[11].mxu1 }
 0x21c   : > { %v664_v6 = vpop.f32.mrb[12].mxu1 }
 0x21d   : > { %v4049_v8 = vpop.f32.mrb[13].mxu1 }
 0x27a   : > { %v1268_v9 = vpop.f32.mrb[0].mxu0 }
 0x27b   : > { %v4971_v10 = vadd.f32 %v1268_v9, %v604_v18  ;;  %v4206_v0 = vpop.f32.mrb[1].mxu0 }
 0x27d   : > { %5276 = vtanh.f32 %v4971_v10 }
 0x27e   : > { %v1274_v11 = vpop.f32.mrb[2].mxu0 }
 0x27f   : > { %v4972_v1 = vadd.f32 %v1274_v11, %v614_v14  ;;  %v4209_v13 = vpop.f32.mrb[3].mxu0  ;;  %v5973_v14 = vand.u32 4294901760, %v1327_v29  ;;  %v1333_v11 = vsel %vm500_vm1, %v1319_v3, 0 }
 0x280   : > { %v6005_v34 = vand.u32 4294901760, %v1333_v11 }
 0x281   : > { %5278 = vtanh.f32 %v4972_v1  ;;  %v5989_v9 = vsub.f32 %v1327_v29, %v5973_v14 }
 0x282   : > { %v1280_v20 = vpop.f32.mrb[4].mxu0 }
 0x283   : > { %v4973_v23 = vadd.f32 %v1280_v20, %v624_v55  ;;  %v4212_v26 = vpop.f32.mrb[5].mxu0  ;;  %v1422_v20 = vsub.f32 %v5969_v60, %v1421_v59 }
 0x284   : > { %v1320_v26 = vld [vmem:[#allocation2 + $0x58] sm:$0xff] }
 0x285   : > { %5280 = vtanh.f32 %v4973_v23  ;;  %v1423_v44 = vand.u32 4294901760, %v1422_v20 }
 0x286   : > { %v1286_v24 = vpop.f32.mrb[6].mxu0 }
 0x287   : > { %v5277_v27 = vpop.eup %5276  ;;  %v4974_v22 = vadd.f32 %v1286_v24, %v634_v40  ;;  %v4215_v28 = vpop.f32.mrb[7].mxu0 }
 0x288   : > { %v1348_v32 = vand.u32 4294901760, %v5277_v27 }
 0x289   : > { %5282 = vtanh.f32 %v4974_v22 }
 0x28a   : > { %v1292_v36 = vpop.f32.mrb[8].mxu0  ;;  %v5946_v37 = vsub.f32 %v5277_v27, %v1348_v32 }
 0x28b   : > { %v5279_v38 = vpop.eup %5278  ;;  %v4975_v41 = vadd.f32 %v1292_v36, %v644_v61  ;;  %v4218_v42 = vpop.f32.mrb[9].mxu0  ;;  %v5980_v61 = vand.u32 4294901760, %v1330_v62 }
 0x28c   : > { %v1351_v43 = vand.u32 4294901760, %v5279_v38  ;;  %v1492_v45 = vand.u32 4294901760, %v5946_v37  ;;  %v1336_v42 = vsel %vm500_vm1, %v1320_v26, 0 }
 0x28d   : > { %5284 = vtanh.f32 %v4975_v41  ;;  %v6001_v23 = vsub.f32 %v1330_v62, %v5980_v61  ;;  %v6028_v53 = vand.u32 4294901760, %v1336_v42 }
 0x28e   : > { %v1298_v47 = vpop.f32.mrb[10].mxu0  ;;  %v5950_v25 = vpack.c.bf16 %v1351_v43, %v1348_v32  ;;  %v5952_v48 = vsub.f32 %v5279_v38, %v1351_v43  ;;  %v1493_v46 = vsub.f32 %v5946_v37, %v1492_v45  ;;  %v1431_v32 = vand.u32 4294901760, %v5989_v9 }
 0x28f   : > { %v5281_v31 = vpop.eup %5280  ;;  %v4976_v51 = vadd.f32 %v1298_v47, %v654_v17  ;;  %v4221_v21 = vpop.f32.mrb[11].mxu0  ;;  %v1321_v47 = vld [vmem:[#allocation2 + $0x60] sm:$0xff] }
 0x290   : > { %4803 = vmatpush3.bf16.msra.mxu1 %v5950_v25  ;;  %v1354_v39 = vand.u32 4294901760, %v5281_v31  ;;  %v1499_v52 = vand.u32 4294901760, %v5952_v48  ;;  %v4820_v54 = vpack.c.bf16 %v5952_v48, %v5946_v37  ;;  %v1494_v49 = vand.u32 4294901760, %v1493_v46 }
 0x291   : > { %5286 = vtanh.f32 %v4976_v51  ;;  %4804 = vmatprep.subr.bf16.mxu1 %v5433_v12  ;;  %v1432_v46 = vsub.f32 %v5989_v9, %v1431_v32 }
 0x292   : > { %v1304_v57 = vpop.f32.mrb[12].mxu0  ;;  %v5962_v7 = vsub.f32 %v5281_v31, %v1354_v39  ;;  %v1500_v19 = vsub.f32 %v5952_v48, %v1499_v52  ;;  %v5966_v50 = vpack.c.bf16 %v1499_v52, %v1492_v45  ;;  %v1441_v45 = vand.u32 4294901760, %v6001_v23 }
 0x293   : > { %v5283_v63 = vpop.eup %5282  ;;  %v4977_v16 = vadd.f32 %v1304_v57, %v664_v6  ;;  %v4224_v58 = vpop.f32.mrb[13].mxu0  ;;  %v6026_v52 = vsub.f32 %v1333_v11, %v6005_v34 }
 0x294   : > { %v1357_v4 = vand.u32 4294901760, %v5283_v63  ;;  %v1501_v18 = vand.u32 4294901760, %v1500_v19  ;;  %v1506_v35 = vand.u32 4294901760, %v5962_v7  ;;  %v1339_v19 = vsel %vm500_vm1, %v1321_v47, 0 }
 0x295   : > { %5288 = vtanh.f32 %v4977_v16  ;;  %v1442_v58 = vsub.f32 %v6001_v23, %v1441_v45 }
 0x296   : > { %v5975_v30 = vpack.c.bf16 %v1357_v4, %v1354_v39  ;;  %v5977_v55 = vsub.f32 %v5283_v63, %v1357_v4  ;;  %v4811_v56 = vpack.c.bf16 %v1501_v18, %v1494_v49  ;;  %v1507_v5 = vsub.f32 %v5962_v7, %v1506_v35  ;;  %v1322_v63 = vld [vmem:[#allocation2 + $0x68] sm:$0x3] }
 0x297   : > { %v5285_v40 = vpop.eup %5284  ;;  %v1433_v49 = vand.u32 4294901760, %v1432_v46  ;;  %v1451_v18 = vand.u32 4294901760, %v6026_v52  ;;  %v2139_v46 = vld [vmem:[#allocation2 + $0x80] sm:$0xff] }
 0x298   : > { %4806 = vmatpush3.bf16.msra.mxu1 %v5975_v30  ;;  %v1360_v17 = vand.u32 4294901760, %v5285_v40  ;;  %v1513_v6 = vand.u32 4294901760, %v5977_v55  ;;  %v4823_v8 = vpack.c.bf16 %v5977_v55, %v5962_v7  ;;  %v1508_v27 = vand.u32 4294901760, %v1507_v5 }
 0x299   : > { %4807 = vmatprep.subr.bf16.mxu1 %v5433_v12  ;;  %v1443_v5 = vand.u32 4294901760, %v1442_v58 }
 0x29a   : > { %v5991_v10 = vsub.f32 %v5285_v40, %v1360_v17  ;;  %v1514_v0 = vsub.f32 %v5977_v55, %v1513_v6  ;;  %v5995_v1 = vpack.c.bf16 %v1513_v6, %v1506_v35  ;;  %v6044_v35 = vsub.f32 %v1336_v42, %v6028_v53  ;;  %v2137_v55 = vld [vmem:[#allocation2 + $0x70] sm:$0xff] }
 0x29b   : > { %v5287_v13 = vpop.eup %5286  ;;  %v6046_v40 = vand.u32 4294901760, %v1339_v19 }
 0x29c   : > { %v1363_v24 = vand.u32 4294901760, %v5287_v13  ;;  %v1515_v22 = vand.u32 4294901760, %v1514_v0  ;;  %v1520_v28 = vand.u32 4294901760, %v5991_v10  ;;  %v1452_v0 = vsub.f32 %v6026_v52, %v1451_v18 }
 0x29d   : > { %v1461_v11 = vand.u32 4294901760, %v6044_v35 }
 0x29e   : > { %v6007_v36 = vpack.c.bf16 %v1363_v24, %v1360_v17  ;;  %v6009_v38 = vsub.f32 %v5287_v13, %v1363_v24  ;;  %v4814_v41 = vpack.c.bf16 %v1515_v22, %v1508_v27  ;;  %v1521_v51 = vsub.f32 %v5991_v10, %v1520_v28 }
 0x29f   : > { %v5289_v43 = vpop.eup %5288  ;;  %v1342_v17 = vsel %vm500_vm1, %v1322_v63, 0  ;;  %v1453_v26 = vand.u32 4294901760, %v1452_v0  ;;  %v1462_v24 = vsub.f32 %v6044_v35, %v1461_v11 }
 0x2a0   : > { %4809 = vmatpush3.bf16.msra.mxu1 %v6007_v36  ;;  %v1345_v31 = vsel %vm522_vm2, %v5289_v43, 0  ;;  %v1527_v21 = vand.u32 4294901760, %v6009_v38  ;;  %v4826_v2 = vpack.c.bf16 %v6009_v38, %v5991_v10  ;;  %v1522_v62 = vand.u32 4294901760, %v1521_v51 }
 0x2a1   : > { %4237 = vmatprep.subr.mxu1 %v5435_v15  ;;  %v6020_v39 = vand.u32 4294901760, %v1345_v31  ;;  %v6060_v13 = vand.u32 4294901760, %v1342_v17  ;;  %v2145_v10 = vsel %vm500_vm1, %v2137_v55, 0 }
 0x2a2   : > { %v1528_v57 = vsub.f32 %v6009_v38, %v1527_v21  ;;  %v6032_v29 = vpack.c.bf16 %v1527_v21, %v1520_v28  ;;  %v6253_v38 = vand.u32 4294901760, %v2145_v10 }
 0x2a3   : > { %v6036_v16 = vsub.f32 %v1345_v31, %v6020_v39  ;;  %v6073_v22 = vsub.f32 %v1342_v17, %v6060_v13 }
 0x2a4   : > { %4238 = vmatpush3.msra.mxu1 %v6020_v39  ;;  %v1529_v4 = vand.u32 4294901760, %v1528_v57  ;;  %v6270_v58 = vsub.f32 %v2145_v10, %v6253_v38 }
 0x2a5   : > { %4240 = vmatmul.mubr.f32.vlgmr.msra.gmra.mrb[14].mxu1 %v1423_v44  ;;  %4810 = vmatprep.subr.bf16.mxu1 %v5433_v12  ;;  %v1534_v6 = vand.u32 4294901760, %v6036_v16  ;;  %v1481_v43 = vand.u32 4294901760, %v6073_v22 }
 0x2a6   : > { %4812 = vmatpush3.bf16.msra.mxu1 %v4811_v56  ;;  %4242 = vmatprep.mubr.msk.f32.mxu1 %vm5434_vm0, %v5435_v15  ;;  %v4817_v3 = vpack.c.bf16 %v1529_v4, %v1522_v62  ;;  %v6058_v56 = vsub.f32 %v1339_v19, %v6046_v40  ;;  %v2151_v62 = vsel %vm500_vm1, %v2139_v46, 0 }
 0x2a7   : > { %4813 = vmatprep.subr.bf16.mxu1 %v5433_v12  ;;  %v1535_v20 = vsub.f32 %v6036_v16, %v1534_v6  ;;  %v1482_v47 = vsub.f32 %v6073_v22, %v1481_v43 }
 0x2a8   : > { %v1471_v27 = vand.u32 4294901760, %v6058_v56 }
 0x2a9   : > { %4243 = vmatmul.mubr.f32.gmra.mrb[16].mxu1 %v1433_v49  ;;  %v1536_v28 = vand.u32 4294901760, %v1535_v20  ;;  %v1483_v31 = vand.u32 4294901760, %v1482_v47  ;;  %v2140_v20 = vld [vmem:[#allocation2 + $0x88] sm:$0xff] }
 0x2aa   : > { %4815 = vmatpush3.bf16.msra.mxu1 %v4814_v41  ;;  %4245 = vmatprep.mubr.msk.f32.mxu1 %vm5434_vm0, %v5435_v15  ;;  %v1463_v41 = vand.u32 4294901760, %v1462_v24  ;;  %v1472_v42 = vsub.f32 %v6058_v56, %v1471_v27 }
 0x2ab   : > { %4816 = vmatprep.subr.bf16.mxu1 %v5433_v12 }
 0x2ac   : > { %v1473_v44 = vand.u32 4294901760, %v1472_v42 }
 0x2ad   : > { %4246 = vmatmul.mubr.f32.gmra.mrb[18].mxu1 %v1443_v5 }
 0x2ae   : > { %4818 = vmatpush3.bf16.msra.mxu1 %v4817_v3  ;;  %4248 = vmatprep.mubr.msk.f32.mxu1 %vm5434_vm0, %v5435_v15 }
 0x2af   : > { %4272 = vmatprep.subr.mxu1 %v5435_v15 }
 0x2b1   : > { %4249 = vmatmul.mubr.f32.gmra.mrb[20].mxu1 %v1453_v26 }
 0x2b2   : > { %4273 = vmatpush3.msra.mxu1 %v1536_v28  ;;  %4251 = vmatprep.mubr.msk.f32.mxu1 %vm5434_vm0, %v5435_v15 }
 0x2b3   : > { %4819 = vmatprep.subr.bf16.mxu1 %v5433_v12 }
 0x2b5   : > { %4252 = vmatmul.mubr.f32.gmra.mrb[22].mxu1 %v1463_v41 }
 0x2b6   : > { %4254 = vmatprep.mubr.msk.f32.mxu1 %vm5434_vm0, %v5435_v15 }
 0x2b9   : > { %4255 = vmatmul.mubr.f32.gmra.mrb[24].mxu1 %v1473_v44 }
 0x2ba   : > { %4257 = vmatprep.mubr.msk.f32.mxu1 %vm5434_vm0, %v5435_v15 }
 0x2bd   : > { %4258 = vmatmul.mubr.f32.gmra.mrb[26].mxu1 %v1483_v31 }
 0x2be   : > { %4274 = vmatprep.mubr.msk.f32.mxu1 %vm5434_vm0, %v5435_v15 }
 0x2c1   : > { %4275 = vmatmul.mubr.f32.vlgmr.msra.gmra.mrb[14].mxu1 %v5954_v33 }
 0x2c2   : > { %4821 = vmatpush3.bf16.msra.mxu1 %v4820_v54  ;;  %4277 = vmatprep.mubr.msk.f32.mxu1 %vm5434_vm0, %v5435_v15 }
 0x2c3   : > { %4822 = vmatprep.subr.bf16.mxu1 %v5433_v12 }
 0x2c5   : > { %4278 = vmatmul.mubr.f32.gmra.mrb[16].mxu1 %v5973_v14 }
 0x2c6   : > { %4824 = vmatpush3.bf16.msra.mxu1 %v4823_v8  ;;  %4280 = vmatprep.mubr.msk.f32.mxu1 %vm5434_vm0, %v5435_v15 }
 0x2c7   : > { %4825 = vmatprep.subr.bf16.mxu1 %v5433_v12 }
 0x2c9   : > { %4281 = vmatmul.mubr.f32.gmra.mrb[18].mxu1 %v5980_v61 }
 0x2ca   : > { %4827 = vmatpush3.bf16.msra.mxu1 %v4826_v2  ;;  %4283 = vmatprep.mubr.msk.f32.mxu1 %vm5434_vm0, %v5435_v15 }
 0x2cb   : > { %4307 = vmatprep.subr.mxu1 %v5435_v15 }
 0x2cd   : > { %4284 = vmatmul.mubr.f32.gmra.mrb[20].mxu1 %v6005_v34 }
 0x2ce   : > { %4308 = vmatpush3.msra.mxu1 %v6036_v16  ;;  %4286 = vmatprep.mubr.msk.f32.mxu1 %vm5434_vm0, %v5435_v15 }
 0x2cf   : > { %4828 = vmatprep.subr.bf16.mxu1 %v5433_v12 }
 0x2d1   : > { %4287 = vmatmul.mubr.f32.gmra.mrb[22].mxu1 %v6028_v53 }
 0x2d2   : > { %4289 = vmatprep.mubr.msk.f32.mxu1 %vm5434_vm0, %v5435_v15 }
 0x2d5   : > { %4290 = vmatmul.mubr.f32.gmra.mrb[24].mxu1 %v6046_v40 }
 0x2d6   : > { %4292 = vmatprep.mubr.msk.f32.mxu1 %vm5434_vm0, %v5435_v15 }
 0x2d9   : > { %4293 = vmatmul.mubr.f32.gmra.mrb[26].mxu1 %v6060_v13 }
 0x2da   : > { %4309 = vmatprep.mubr.msk.f32.mxu1 %vm5434_vm0, %v5435_v15 }
 0x2dd   : > { %4310 = vmatmul.mubr.f32.vlgmr.msra.gmra.mrb[14].mxu1 %v5969_v60 }
 0x2de   : > { %4830 = vmatpush3.bf16.msra.mxu1 %v5950_v25  ;;  %4312 = vmatprep.mubr.msk.f32.mxu1 %vm5434_vm0, %v5435_v15 }
 0x2df   : > { %4831 = vmatprep.subr.bf16.mxu1 %v5433_v12 }
 0x2e1   : > { %4313 = vmatmul.mubr.f32.gmra.mrb[16].mxu1 %v5989_v9 }
 0x2e2   : > { %4833 = vmatpush3.bf16.msra.mxu1 %v5975_v30  ;;  %4315 = vmatprep.mubr.msk.f32.mxu1 %vm5434_vm0, %v5435_v15 }
 0x2e3   : > { %4834 = vmatprep.subr.bf16.mxu1 %v5433_v12 }
 0x2e5   : > { %4316 = vmatmul.mubr.f32.gmra.mrb[18].mxu1 %v6001_v23 }
 0x2e6   : > { %4836 = vmatpush3.bf16.msra.mxu1 %v6007_v36  ;;  %4318 = vmatprep.mubr.msk.f32.mxu1 %vm5434_vm0, %v5435_v15 }
 0x2e7   : > { %4342 = vmatprep.subr.mxu1 %v5435_v15 }
 0x2e9   : > { %4319 = vmatmul.mubr.f32.gmra.mrb[20].mxu1 %v6026_v52 }
 0x2ea   : > { %4343 = vmatpush3.msra.mxu1 %v6020_v39  ;;  %4321 = vmatprep.mubr.msk.f32.mxu1 %vm5434_vm0, %v5435_v15 }
 0x2eb   : > { %4837 = vmatprep.subr.bf16.mxu1 %v5433_v12 }
 0x2ed   : > { %4322 = vmatmul.mubr.f32.gmra.mrb[22].mxu1 %v6044_v35 }
 0x2ee   : > { %4324 = vmatprep.mubr.msk.f32.mxu1 %vm5434_vm0, %v5435_v15 }
 0x2f1   : > { %4325 = vmatmul.mubr.f32.gmra.mrb[24].mxu1 %v6058_v56  ;;  %v2242_v56 = vand.u32 4294901760, %v6270_v58 }
 0x2f2   : > { %4327 = vmatprep.mubr.msk.f32.mxu1 %vm5434_vm0, %v5435_v15 }
 0x2f3   : > { %v2243_v31 = vsub.f32 %v6270_v58, %v2242_v56 }
 0x2f5   : > { %4328 = vmatmul.mubr.f32.gmra.mrb[26].mxu1 %v6073_v22 }
 0x2f6   : > { %4344 = vmatprep.mubr.msk.f32.mxu1 %vm5434_vm0, %v5435_v15 }
 0x2f9   : > { %4345 = vmatmul.mubr.f32.vlgmr.msra.gmra.mrb[14].mxu1 %v1421_v59 }
 0x2fa   : > { %4839 = vmatpush3.bf16.msra.mxu1 %v5966_v50  ;;  %4347 = vmatprep.mubr.msk.f32.mxu1 %vm5434_vm0, %v5435_v15 }
 0x2fb   : > { %4840 = vmatprep.subr.bf16.mxu1 %v5433_v12 }
 0x2fd   : > { %4348 = vmatmul.mubr.f32.gmra.mrb[16].mxu1 %v1431_v32 }
 0x2fe   : > { %4842 = vmatpush3.bf16.msra.mxu1 %v5995_v1  ;;  %4350 = vmatprep.mubr.msk.f32.mxu1 %vm5434_vm0, %v5435_v15 }
 0x2ff   : > { %4843 = vmatprep.subr.bf16.mxu1 %v5433_v12 }
 0x301   : > { %4351 = vmatmul.mubr.f32.gmra.mrb[18].mxu1 %v1441_v45  ;;  %v2138_v45 = vld [vmem:[#allocation2 + $0x78] sm:$0xff] }
 0x302   : > { %4845 = vmatpush3.bf16.msra.mxu1 %v6032_v29  ;;  %4353 = vmatprep.mubr.msk.f32.mxu1 %vm5434_vm0, %v5435_v15  ;;  %v2148_v29 = vsel %vm500_vm1, %v2138_v45, 0 }
 0x303   : > { %4377 = vmatprep.subr.mxu1 %v5435_v15  ;;  %v6274_v17 = vand.u32 4294901760, %v2148_v29 }
 0x305   : > { %4354 = vmatmul.mubr.f32.gmra.mrb[20].mxu1 %v1451_v18  ;;  %v6294_v28 = vsub.f32 %v2148_v29, %v6274_v17 }
 0x306   : > { %4378 = vmatpush3.msra.mxu1 %v1534_v6  ;;  %4356 = vmatprep.mubr.msk.f32.mxu1 %vm5434_vm0, %v5435_v15 }
 0x307   : > { %4846 = vmatprep.subr.bf16.mxu1 %v5433_v12 }
 0x309   : > { %4357 = vmatmul.mubr.f32.gmra.mrb[22].mxu1 %v1461_v11 }
 0x30a   : > { %4359 = vmatprep.mubr.msk.f32.mxu1 %vm5434_vm0, %v5435_v15 }
 0x30d   : > { %4360 = vmatmul.mubr.f32.gmra.mrb[24].mxu1 %v1471_v27 }
 0x30e   : > { %4362 = vmatprep.mubr.msk.f32.mxu1 %vm5434_vm0, %v5435_v15 }
 0x311   : > { %4363 = vmatmul.mubr.f32.gmra.mrb[26].mxu1 %v1481_v43  ;;  %v2154_v43 = vsel %vm500_vm1, %v2140_v20, 0 }
 0x312   : > { %4379 = vmatprep.mubr.msk.f32.mxu1 %vm5434_vm0, %v5435_v15 }
 0x315   : > { %4380 = vmatmul.mubr.f32.vlgmr.msra.gmra.mrb[14].mxu1 %v5954_v33 }
 0x316   : > { %4848 = vmatpush3.bf16.msra.mxu1 %v5950_v25  ;;  %4382 = vmatprep.mubr.msk.f32.mxu1 %vm5434_vm0, %v5435_v15 }
 0x317   : > { %4849 = vmatprep.subr.bf16.mxu1 %v5433_v12 }
 0x319   : > { %4383 = vmatmul.mubr.f32.gmra.mrb[16].mxu1 %v5973_v14 }
 0x31a   : > { %4851 = vmatpush3.bf16.msra.mxu1 %v5975_v30  ;;  %4385 = vmatprep.mubr.msk.f32.mxu1 %vm5434_vm0, %v5435_v15 }
 0x31b   : > { %4852 = vmatprep.subr.bf16.mxu1 %v5433_v12 }
 0x31d   : > { %4386 = vmatmul.mubr.f32.gmra.mrb[18].mxu1 %v5980_v61 }
 0x31e   : > { %4854 = vmatpush3.bf16.msra.mxu1 %v6007_v36  ;;  %4388 = vmatprep.mubr.msk.f32.mxu1 %vm5434_vm0, %v5435_v15 }
 0x31f   : > { %4412 = vmatprep.subr.mxu1 %v5435_v15 }
 0x321   : > { %4389 = vmatmul.mubr.f32.gmra.mrb[20].mxu1 %v6005_v34 }
 0x322   : > { %4413 = vmatpush3.msra.mxu1 %v6020_v39  ;;  %4391 = vmatprep.mubr.msk.f32.mxu1 %vm5434_vm0, %v5435_v15 }
 0x323   : > { %4963 = vmatprep.subr.bf16.mxu1 %v5433_v12 }
 0x325   : > { %4392 = vmatmul.mubr.f32.gmra.mrb[22].mxu1 %v6028_v53 }
 0x326   : > { %4394 = vmatprep.mubr.msk.f32.mxu1 %vm5434_vm0, %v5435_v15 }
 0x329   : > { %4395 = vmatmul.mubr.f32.gmra.mrb[24].mxu1 %v6046_v40 }
 0x32a   : > { %4397 = vmatprep.mubr.msk.f32.mxu1 %vm5434_vm0, %v5435_v15 }
 0x32d   : > { %4398 = vmatmul.mubr.f32.gmra.mrb[26].mxu1 %v6060_v13 }
 0x32e   : > { %4414 = vmatprep.mubr.msk.f32.mxu1 %vm5434_vm0, %v5435_v15 }
 0x331   : > { %4415 = vmatmul.mubr.f32.vlgmr.msra.gmra.mrb[14].mxu1 %v5954_v33 }
 0x332   : > { %4417 = vmatprep.mubr.msk.f32.mxu1 %vm5434_vm0, %v5435_v15 }
 0x335   : > { %4418 = vmatmul.mubr.f32.gmra.mrb[16].mxu1 %v5973_v14 }
 0x336   : > { %4420 = vmatprep.mubr.msk.f32.mxu1 %vm5434_vm0, %v5435_v15 }
 0x339   : > { %4421 = vmatmul.mubr.f32.gmra.mrb[18].mxu1 %v5980_v61 }
 0x33a   : > { %4423 = vmatprep.mubr.msk.f32.mxu1 %vm5434_vm0, %v5435_v15 }
 0x33d   : > { %4424 = vmatmul.mubr.f32.gmra.mrb[20].mxu1 %v6005_v34 }
 0x33e   : > { %4426 = vmatprep.mubr.msk.f32.mxu1 %vm5434_vm0, %v5435_v15 }
 0x341   : > { %4427 = vmatmul.mubr.f32.gmra.mrb[22].mxu1 %v6028_v53 }
 0x342   : > { %4429 = vmatprep.mubr.msk.f32.mxu1 %vm5434_vm0, %v5435_v15 }
 0x345   : > { %4430 = vmatmul.mubr.f32.gmra.mrb[24].mxu1 %v6046_v40 }
 0x346   : > { %4432 = vmatprep.mubr.msk.f32.mxu1 %vm5434_vm0, %v5435_v15 }
 0x349   : > { %4433 = vmatmul.mubr.f32.gmra.mrb[26].mxu1 %v6060_v13  ;;  %v6283_v13 = vand.u32 4294901760, %v2151_v62 }
 0x34a   : > { %4633 = vmatprep.mubr.msk.f32.mxu1 %vm5434_vm0, %v5435_v15 }
 0x404   : > { %v2089_v37 = vpop.f32.mrb[14].mxu1 }
 0x405   : > { %5290 = vtanh.f32 %v2089_v37  ;;  %v4416_v25 = vpop.f32.mrb[15].mxu1  ;;  %v6306_v37 = vsub.f32 %v2151_v62, %v6283_v13 }
 0x406   : > { %v2141_v25 = vld [vmem:[#allocation2 + $0x90] sm:$0xff] }
 0x407   : > { %v2262_v10 = vand.u32 4294901760, %v6306_v37 }
 0x408   : > { %v2095_v48 = vpop.f32.mrb[16].mxu1 }
 0x409   : > { %5292 = vtanh.f32 %v2095_v48  ;;  %v4419_v33 = vpop.f32.mrb[17].mxu1  ;;  %v2263_v62 = vsub.f32 %v6306_v37, %v2262_v10 }
 0x40c   : > { %v2101_v54 = vpop.f32.mrb[18].mxu1 }
 0x40d   : > { %5294 = vtanh.f32 %v2101_v54  ;;  %v4422_v7 = vpop.f32.mrb[19].mxu1 }
 0x40f   : > { %v5291_v50 = vpop.eup %5290 }
 0x410   : > { %v2107_v60 = vpop.f32.mrb[20].mxu1  ;;  %v2169_v14 = vand.u32 4294901760, %v5291_v50 }
 0x411   : > { %5296 = vtanh.f32 %v2107_v60  ;;  %v4425_v30 = vpop.f32.mrb[21].mxu1  ;;  %v6310_v60 = vand.u32 4294901760, %v2154_v43 }
 0x412   : > { %v6245_v59 = vsub.f32 %v5291_v50, %v2169_v14  ;;  %v2252_v50 = vand.u32 4294901760, %v6294_v28 }
 0x413   : > { %v5293_v61 = vpop.eup %5292 }
 0x414   : > { %v2113_v8 = vpop.f32.mrb[22].mxu1  ;;  %v2172_v9 = vand.u32 4294901760, %v5293_v61  ;;  %v2313_v1 = vand.u32 4294901760, %v6245_v59 }
 0x415   : > { %5298 = vtanh.f32 %v2113_v8  ;;  %v4428_v23 = vpop.f32.mrb[23].mxu1 }
 0x416   : > { %v6249_v32 = vpack.c.bf16 %v2172_v9, %v2169_v14  ;;  %v6251_v34 = vsub.f32 %v5293_v61, %v2172_v9  ;;  %v2314_v2 = vsub.f32 %v6245_v59, %v2313_v1  ;;  %v2157_v61 = vsel %vm500_vm1, %v2141_v25, 0 }
 0x417   : > { %v5295_v36 = vpop.eup %5294  ;;  %v2244_v9 = vand.u32 4294901760, %v2243_v31  ;;  %v6335_v46 = vand.u32 4294901760, %v2157_v61 }
 0x418   : > { %v2119_v51 = vpop.f32.mrb[24].mxu1  ;;  %4857 = vmatpush3.bf16.msra.mxu0 %v6249_v32  ;;  %4967 = vmatpush3.bf16.msra.mxu1 %v6249_v32  ;;  %v2175_v21 = vand.u32 4294901760, %v5295_v36  ;;  %v2320_v39 = vand.u32 4294901760, %v6251_v34  ;;  %v4874_v52 = vpack.c.bf16 %v6251_v34, %v6245_v59  ;;  %v2315_v18 = vand.u32 4294901760, %v2314_v2 }
 0x419   : > { %5300 = vtanh.f32 %v2119_v51  ;;  %v4431_v53 = vpop.f32.mrb[25].mxu1  ;;  %4858 = vmatprep.subr.bf16.mxu0 %v5433_v12  ;;  %4964 = vmatprep.subr.bf16.mxu1 %v5433_v12  ;;  %v2253_v2 = vsub.f32 %v6294_v28, %v2252_v50 }
 0x41a   : > { %v6263_v57 = vsub.f32 %v5295_v36, %v2175_v21  ;;  %v2321_v19 = vsub.f32 %v6251_v34, %v2320_v39  ;;  %v6267_v63 = vpack.c.bf16 %v2320_v39, %v2313_v1  ;;  %v2142_v1 = vld [vmem:[#allocation2 + $0x98] sm:$0xff]  ;;  %v6333_v39 = vsub.f32 %v2154_v43, %v6310_v60 }
 0x41b   : > { %v5297_v16 = vpop.eup %5296 }
 0x41c   : > { %v2125_v4 = vpop.f32.mrb[26].mxu1  ;;  %v2178_v49 = vand.u32 4294901760, %v5297_v16  ;;  %v2322_v35 = vand.u32 4294901760, %v2321_v19  ;;  %v2327_v40 = vand.u32 4294901760, %v6263_v57  ;;  %v2160_v19 = vsel %vm500_vm1, %v2142_v1, 0 }
 0x41d   : > { %5302 = vtanh.f32 %v2125_v4  ;;  %v4434_v3 = vpop.f32.mrb[27].mxu1 }
 0x41e   : > { %v6276_v5 = vpack.c.bf16 %v2178_v49, %v2175_v21  ;;  %v6278_v6 = vsub.f32 %v5297_v16, %v2178_v49  ;;  %v6280_v0 = vpack.c.bf16 %v2322_v35, %v2315_v18  ;;  %v2328_v24 = vsub.f32 %v6263_v57, %v2327_v40  ;;  %v2143_v16 = vld [vmem:[#allocation2 + $0xa0] sm:$0x3] }
 0x41f   : > { %v5299_v11 = vpop.eup %5298  ;;  %v2254_v35 = vand.u32 4294901760, %v2253_v2  ;;  %v6352_v3 = vsub.f32 %v2157_v61, %v6335_v46 }
 0x420   : > { %4860 = vmatpush3.bf16.msra.mxu0 %v6276_v5  ;;  %4968 = vmatpush3.bf16.msra.mxu1 %v6276_v5  ;;  %v2181_v26 = vand.u32 4294901760, %v5299_v11  ;;  %v2334_v27 = vand.u32 4294901760, %v6278_v6  ;;  %v4877_v22 = vpack.c.bf16 %v6278_v6, %v6263_v57  ;;  %v2329_v33 = vand.u32 4294901760, %v2328_v24 }
 0x421   : > { %4861 = vmatprep.subr.bf16.mxu0 %v5433_v12  ;;  %4965 = vmatprep.subr.bf16.mxu1 %v5433_v12  ;;  %v2264_v24 = vand.u32 4294901760, %v2263_v62 }
 0x422   : > { %v6296_v41 = vsub.f32 %v5299_v11, %v2181_v26  ;;  %v2335_v42 = vsub.f32 %v6278_v6, %v2334_v27  ;;  %v6300_v44 = vpack.c.bf16 %v2334_v27, %v2327_v40  ;;  %v2272_v40 = vand.u32 4294901760, %v6333_v39 }
 0x423   : > { %v5301_v47 = vpop.eup %5300  ;;  %v6354_v11 = vand.u32 4294901760, %v2160_v19 }
 0x424   : > { %v2184_v48 = vand.u32 4294901760, %v5301_v47  ;;  %v2336_v54 = vand.u32 4294901760, %v2335_v42  ;;  %v2341_v7 = vand.u32 4294901760, %v6296_v41  ;;  %v2282_v42 = vand.u32 4294901760, %v6352_v3 }
 0x425   : > { %v6371_v43 = vsub.f32 %v2160_v19, %v6354_v11 }
 0x426   : > { %v6312_v14 = vpack.c.bf16 %v2184_v48, %v2181_v26  ;;  %v6314_v30 = vsub.f32 %v5301_v47, %v2184_v48  ;;  %v4868_v55 = vpack.c.bf16 %v2336_v54, %v2329_v33  ;;  %v2342_v36 = vsub.f32 %v6296_v41, %v2341_v7 }
 0x427   : > { %v5303_v8 = vpop.eup %5302  ;;  %v2163_v26 = vsel %vm500_vm1, %v2143_v16, 0  ;;  %v2283_v48 = vsub.f32 %v6352_v3, %v2282_v42  ;;  %v2292_v33 = vand.u32 4294901760, %v6371_v43 }
 0x428   : > { %v2166_v23 = vsel %vm522_vm2, %v5303_v8, 0  ;;  %4863 = vmatpush3.bf16.msra.mxu0 %v6312_v14  ;;  %4969 = vmatpush3.bf16.msra.mxu1 %v6312_v14  ;;  %v2348_v45 = vand.u32 4294901760, %v6314_v30  ;;  %v4880_v51 = vpack.c.bf16 %v6314_v30, %v6296_v41  ;;  %v2343_v4 = vand.u32 4294901760, %v2342_v36 }
 0x429   : > { %4447 = vmatprep.subr.mxu0 %v5435_v15  ;;  %4966 = vmatprep.subr.mxu1 %v5435_v15  ;;  %v6327_v21 = vand.u32 4294901760, %v2166_v23  ;;  %v6373_v47 = vand.u32 4294901760, %v2163_v26  ;;  %v2293_v61 = vsub.f32 %v6371_v43, %v2292_v33 }
 0x42a   : > { %v2349_v53 = vsub.f32 %v6314_v30, %v2348_v45  ;;  %v6339_v29 = vpack.c.bf16 %v2348_v45, %v2341_v7 }
 0x42b   : > { %v6347_v18 = vsub.f32 %v2166_v23, %v6327_v21  ;;  %v6389_v54 = vsub.f32 %v2163_v26, %v6373_v47 }
 0x42c   : > { %4448 = vmatpush3.msra.mxu0 %v6327_v21  ;;  %4970 = vmatpush3.msra.mxu1 %v6327_v21  ;;  %v2350_v49 = vand.u32 4294901760, %v2349_v53  ;;  %v2957_v53 = vld [vmem:[%s6705_s4] sm:$0x1f] }
 0x42d   : > { %4450 = vmatmul.mubr.f32.vlgmr.msra.gmra.mrb[14].mxu0 %v2244_v9  ;;  %4864 = vmatprep.subr.bf16.mxu0 %v5433_v12  ;;  %v2355_v27 = vand.u32 4294901760, %v6347_v18  ;;  %v2302_v8 = vand.u32 4294901760, %v6389_v54  ;;  %v2294_v9 = vand.u32 4294901760, %v2293_v61 }
 0x42e   : > { %4866 = vmatpush3.bf16.msra.mxu0 %v6280_v0  ;;  %4452 = vmatprep.mubr.msk.f32.mxu0 %vm5434_vm0, %v5435_v15  ;;  %v4871_v20 = vpack.c.bf16 %v2350_v49, %v2343_v4  ;;  %v2273_v0 = vsub.f32 %v6333_v39, %v2272_v40  ;;  %v2959_v49 = vsel %vm500_vm1, %v2957_v53, 0 }
 0x42f   : > { %4867 = vmatprep.subr.bf16.mxu0 %v5433_v12  ;;  %4634 = vmatmul.mubr.f32.vlgmr.msra.gmra.mrb[28].mxu1 %v6310_v60  ;;  %v2356_v31 = vsub.f32 %v6347_v18, %v2355_v27  ;;  %v2303_v1 = vsub.f32 %v6389_v54, %v2302_v8 }
 0x430   : > { %4636 = vmatprep.mubr.msk.f32.mxu1 %vm5434_vm0, %v5435_v15  ;;  %4909 = vmatprep.subr.bf16.mxu1 %v5433_v12  ;;  %v2274_v25 = vand.u32 4294901760, %v2273_v0 }
 0x431   : > { %4453 = vmatmul.mubr.f32.gmra.mrb[16].mxu0 %v2254_v35  ;;  %v2357_v7 = vand.u32 4294901760, %v2356_v31  ;;  %v2304_v23 = vand.u32 4294901760, %v2303_v1 }
 0x432   : > { %4869 = vmatpush3.bf16.msra.mxu0 %v4868_v55  ;;  %4455 = vmatprep.mubr.msk.f32.mxu0 %vm5434_vm0, %v5435_v15  ;;  %v2284_v55 = vand.u32 4294901760, %v2283_v48 }
 0x433   : > { %4870 = vmatprep.subr.bf16.mxu0 %v5433_v12  ;;  %4637 = vmatmul.mubr.f32.gmra.mrb[30].mxu1 %v6335_v46 }
 0x434   : > { %4639 = vmatprep.mubr.msk.f32.mxu1 %vm5434_vm0, %v5435_v15 }
 0x435   : > { %4456 = vmatmul.mubr.f32.gmra.mrb[18].mxu0 %v2264_v24 }
 0x436   : > { %4872 = vmatpush3.bf16.msra.mxu0 %v4871_v20  ;;  %4458 = vmatprep.mubr.msk.f32.mxu0 %vm5434_vm0, %v5435_v15 }
 0x437   : > { %4482 = vmatprep.subr.mxu0 %v5435_v15  ;;  %4640 = vmatmul.mubr.f32.gmra.mrb[32].mxu1 %v6354_v11 }
 0x438   : > { %4642 = vmatprep.mubr.msk.f32.mxu1 %vm5434_vm0, %v5435_v15 }
 0x439   : > { %4459 = vmatmul.mubr.f32.gmra.mrb[20].mxu0 %v2274_v25 }
 0x43a   : > { %4483 = vmatpush3.msra.mxu0 %v2357_v7  ;;  %4461 = vmatprep.mubr.msk.f32.mxu0 %vm5434_vm0, %v5435_v15 }
 0x43b   : > { %4873 = vmatprep.subr.bf16.mxu0 %v5433_v12  ;;  %4643 = vmatmul.mubr.f32.gmra.mrb[34].mxu1 %v6373_v47 }
 0x43c   : > { %4659 = vmatprep.mubr.msk.f32.mxu1 %vm5434_vm0, %v5435_v15 }
 0x43d   : > { %4462 = vmatmul.mubr.f32.gmra.mrb[22].mxu0 %v2284_v55 }
 0x43e   : > { %4464 = vmatprep.mubr.msk.f32.mxu0 %vm5434_vm0, %v5435_v15 }
 0x441   : > { %4465 = vmatmul.mubr.f32.gmra.mrb[24].mxu0 %v2294_v9 }
 0x442   : > { %4467 = vmatprep.mubr.msk.f32.mxu0 %vm5434_vm0, %v5435_v15 }
 0x445   : > { %4468 = vmatmul.mubr.f32.gmra.mrb[26].mxu0 %v2304_v23 }
 0x446   : > { %4484 = vmatprep.mubr.msk.f32.mxu0 %vm5434_vm0, %v5435_v15 }
 0x449   : > { %4485 = vmatmul.mubr.f32.vlgmr.msra.gmra.mrb[14].mxu0 %v6253_v38 }
 0x44a   : > { %4875 = vmatpush3.bf16.msra.mxu0 %v4874_v52  ;;  %4487 = vmatprep.mubr.msk.f32.mxu0 %vm5434_vm0, %v5435_v15 }
 0x44b   : > { %4876 = vmatprep.subr.bf16.mxu0 %v5433_v12 }
 0x44d   : > { %4488 = vmatmul.mubr.f32.gmra.mrb[16].mxu0 %v6274_v17 }
 0x44e   : > { %4878 = vmatpush3.bf16.msra.mxu0 %v4877_v22  ;;  %4490 = vmatprep.mubr.msk.f32.mxu0 %vm5434_vm0, %v5435_v15 }
 0x44f   : > { %4879 = vmatprep.subr.bf16.mxu0 %v5433_v12 }
 0x451   : > { %4491 = vmatmul.mubr.f32.gmra.mrb[18].mxu0 %v6283_v13 }
 0x452   : > { %4881 = vmatpush3.bf16.msra.mxu0 %v4880_v51  ;;  %4493 = vmatprep.mubr.msk.f32.mxu0 %vm5434_vm0, %v5435_v15 }
 0x453   : > { %4517 = vmatprep.subr.mxu0 %v5435_v15 }
 0x455   : > { %4494 = vmatmul.mubr.f32.gmra.mrb[20].mxu0 %v6310_v60 }
 0x456   : > { %4518 = vmatpush3.msra.mxu0 %v6347_v18  ;;  %4496 = vmatprep.mubr.msk.f32.mxu0 %vm5434_vm0, %v5435_v15 }
 0x457   : > { %4882 = vmatprep.subr.bf16.mxu0 %v5433_v12 }
 0x459   : > { %4497 = vmatmul.mubr.f32.gmra.mrb[22].mxu0 %v6335_v46 }
 0x45a   : > { %4499 = vmatprep.mubr.msk.f32.mxu0 %vm5434_vm0, %v5435_v15 }
 0x45d   : > { %4500 = vmatmul.mubr.f32.gmra.mrb[24].mxu0 %v6354_v11 }
 0x45e   : > { %4502 = vmatprep.mubr.msk.f32.mxu0 %vm5434_vm0, %v5435_v15 }
 0x461   : > { %4503 = vmatmul.mubr.f32.gmra.mrb[26].mxu0 %v6373_v47 }
 0x462   : > { %4519 = vmatprep.mubr.msk.f32.mxu0 %vm5434_vm0, %v5435_v15 }
 0x465   : > { %4520 = vmatmul.mubr.f32.vlgmr.msra.gmra.mrb[14].mxu0 %v6270_v58 }
 0x466   : > { %4884 = vmatpush3.bf16.msra.mxu0 %v6249_v32  ;;  %4522 = vmatprep.mubr.msk.f32.mxu0 %vm5434_vm0, %v5435_v15 }
 0x467   : > { %4885 = vmatprep.subr.bf16.mxu0 %v5433_v12 }
 0x469   : > { %4523 = vmatmul.mubr.f32.gmra.mrb[16].mxu0 %v6294_v28 }
 0x46a   : > { %4887 = vmatpush3.bf16.msra.mxu0 %v6276_v5  ;;  %4525 = vmatprep.mubr.msk.f32.mxu0 %vm5434_vm0, %v5435_v15 }
 0x46b   : > { %4888 = vmatprep.subr.bf16.mxu0 %v5433_v12 }
 0x46d   : > { %4526 = vmatmul.mubr.f32.gmra.mrb[18].mxu0 %v6306_v37 }
 0x46e   : > { %4890 = vmatpush3.bf16.msra.mxu0 %v6312_v14  ;;  %4528 = vmatprep.mubr.msk.f32.mxu0 %vm5434_vm0, %v5435_v15 }
 0x46f   : > { %4552 = vmatprep.subr.mxu0 %v5435_v15 }
 0x471   : > { %4529 = vmatmul.mubr.f32.gmra.mrb[20].mxu0 %v6333_v39 }
 0x472   : > { %4553 = vmatpush3.msra.mxu0 %v6327_v21  ;;  %4531 = vmatprep.mubr.msk.f32.mxu0 %vm5434_vm0, %v5435_v15 }
 0x473   : > { %4891 = vmatprep.subr.bf16.mxu0 %v5433_v12 }
 0x475   : > { %4532 = vmatmul.mubr.f32.gmra.mrb[22].mxu0 %v6352_v3 }
 0x476   : > { %4534 = vmatprep.mubr.msk.f32.mxu0 %vm5434_vm0, %v5435_v15 }
 0x479   : > { %4535 = vmatmul.mubr.f32.gmra.mrb[24].mxu0 %v6371_v43 }
 0x47a   : > { %4537 = vmatprep.mubr.msk.f32.mxu0 %vm5434_vm0, %v5435_v15 }
 0x47d   : > { %4538 = vmatmul.mubr.f32.gmra.mrb[26].mxu0 %v6389_v54 }
 0x47e   : > { %4554 = vmatprep.mubr.msk.f32.mxu0 %vm5434_vm0, %v5435_v15 }
 0x481   : > { %4555 = vmatmul.mubr.f32.vlgmr.msra.gmra.mrb[14].mxu0 %v2242_v56 }
 0x482   : > { %4893 = vmatpush3.bf16.msra.mxu0 %v6267_v63  ;;  %4557 = vmatprep.mubr.msk.f32.mxu0 %vm5434_vm0, %v5435_v15 }
 0x483   : > { %4894 = vmatprep.subr.bf16.mxu0 %v5433_v12 }
 0x485   : > { %4558 = vmatmul.mubr.f32.gmra.mrb[16].mxu0 %v2252_v50 }
 0x486   : > { %4896 = vmatpush3.bf16.msra.mxu0 %v6300_v44  ;;  %4560 = vmatprep.mubr.msk.f32.mxu0 %vm5434_vm0, %v5435_v15 }
 0x487   : > { %4897 = vmatprep.subr.bf16.mxu0 %v5433_v12 }
 0x489   : > { %4561 = vmatmul.mubr.f32.gmra.mrb[18].mxu0 %v2262_v10 }
 0x48a   : > { %4899 = vmatpush3.bf16.msra.mxu0 %v6339_v29  ;;  %4563 = vmatprep.mubr.msk.f32.mxu0 %vm5434_vm0, %v5435_v15 }
 0x48b   : > { %4587 = vmatprep.subr.mxu0 %v5435_v15 }
 0x48d   : > { %4564 = vmatmul.mubr.f32.gmra.mrb[20].mxu0 %v2272_v40 }
 0x48e   : > { %4588 = vmatpush3.msra.mxu0 %v2355_v27  ;;  %4566 = vmatprep.mubr.msk.f32.mxu0 %vm5434_vm0, %v5435_v15  ;;  %v6570_v27 = vand.u32 4294901760, %v2959_v49 }
 0x48f   : > { %4900 = vmatprep.subr.bf16.mxu0 %v5433_v12 }
 0x490   : > { %v6573_v54 = vsub.f32 %v2959_v49, %v6570_v27 }
 0x491   : > { %4567 = vmatmul.mubr.f32.gmra.mrb[22].mxu0 %v2282_v42 }
 0x492   : > { %4569 = vmatprep.mubr.msk.f32.mxu0 %vm5434_vm0, %v5435_v15 }
 0x495   : > { %4570 = vmatmul.mubr.f32.gmra.mrb[24].mxu0 %v2292_v33 }
 0x496   : > { %4572 = vmatprep.mubr.msk.f32.mxu0 %vm5434_vm0, %v5435_v15 }
 0x499   : > { %4573 = vmatmul.mubr.f32.gmra.mrb[26].mxu0 %v2302_v8 }
 0x49a   : > { %4589 = vmatprep.mubr.msk.f32.mxu0 %vm5434_vm0, %v5435_v15 }
 0x49d   : > { %4590 = vmatmul.mubr.f32.vlgmr.msra.gmra.mrb[14].mxu0 %v6253_v38 }
 0x49e   : > { %4902 = vmatpush3.bf16.msra.mxu0 %v6249_v32  ;;  %4592 = vmatprep.mubr.msk.f32.mxu0 %vm5434_vm0, %v5435_v15 }
 0x49f   : > { %4903 = vmatprep.subr.bf16.mxu0 %v5433_v12 }
 0x4a1   : > { %4593 = vmatmul.mubr.f32.gmra.mrb[16].mxu0 %v6274_v17 }
 0x4a2   : > { %4905 = vmatpush3.bf16.msra.mxu0 %v6276_v5  ;;  %4595 = vmatprep.mubr.msk.f32.mxu0 %vm5434_vm0, %v5435_v15 }
 0x4a3   : > { %4906 = vmatprep.subr.bf16.mxu0 %v5433_v12 }
 0x4a5   : > { %4596 = vmatmul.mubr.f32.gmra.mrb[18].mxu0 %v6283_v13 }
 0x4a6   : > { %4908 = vmatpush3.bf16.msra.mxu0 %v6312_v14  ;;  %4598 = vmatprep.mubr.msk.f32.mxu0 %vm5434_vm0, %v5435_v15 }
 0x4a7   : > { %4622 = vmatprep.subr.mxu0 %v5435_v15 }
 0x4a9   : > { %4599 = vmatmul.mubr.f32.gmra.mrb[20].mxu0 %v6310_v60 }
 0x4aa   : > { %4623 = vmatpush3.msra.mxu0 %v6327_v21  ;;  %4601 = vmatprep.mubr.msk.f32.mxu0 %vm5434_vm0, %v5435_v15 }
 0x4ad   : > { %4602 = vmatmul.mubr.f32.gmra.mrb[22].mxu0 %v6335_v46 }
 0x4ae   : > { %4604 = vmatprep.mubr.msk.f32.mxu0 %vm5434_vm0, %v5435_v15 }
 0x4b1   : > { %4605 = vmatmul.mubr.f32.gmra.mrb[24].mxu0 %v6354_v11 }
 0x4b2   : > { %4607 = vmatprep.mubr.msk.f32.mxu0 %vm5434_vm0, %v5435_v15 }
 0x4b5   : > { %4608 = vmatmul.mubr.f32.gmra.mrb[26].mxu0 %v6373_v47 }
 0x4b6   : > { %4624 = vmatprep.mubr.msk.f32.mxu0 %vm5434_vm0, %v5435_v15 }
 0x4b9   : > { %4625 = vmatmul.mubr.f32.vlgmr.msra.gmra.mrb[14].mxu0 %v6253_v38 }
 0x4ba   : > { %4627 = vmatprep.mubr.msk.f32.mxu0 %vm5434_vm0, %v5435_v15 }
 0x4bd   : > { %4628 = vmatmul.mubr.f32.gmra.mrb[16].mxu0 %v6274_v17 }
 0x4be   : > { %4630 = vmatprep.mubr.msk.f32.mxu0 %vm5434_vm0, %v5435_v15 }
 0x4c1   : > { %4631 = vmatmul.mubr.f32.gmra.mrb[18].mxu0 %v6283_v13 }
 0x502   : > { %v2928_v59 = vpop.f32.mrb[28].mxu1 }
 0x503   : > { %v4635_v32 = vpop.f32.mrb[29].mxu1 }
 0x504   : > { %v3038_v32 = vand.u32 4294901760, %v6573_v54 }
 0x506   : > { %v2934_v34 = vpop.f32.mrb[30].mxu1 }
 0x507   : > { %v4638_v52 = vpop.f32.mrb[31].mxu1 }
 0x50a   : > { %v2940_v57 = vpop.f32.mrb[32].mxu1 }
 0x50b   : > { %v4641_v63 = vpop.f32.mrb[33].mxu1 }
 0x50e   : > { %v2946_v58 = vpop.f32.mrb[34].mxu1 }
 0x50f   : > { %v4644_v5 = vpop.f32.mrb[35].mxu1 }
 0x57c   : > { %v2814_v6 = vpop.f32.mrb[20].mxu0 }
 0x57d   : > { %v4978_v38 = vadd.f32 %v2928_v59, %v2814_v6  ;;  %v4600_v56 = vpop.f32.mrb[21].mxu0 }
 0x580   : > { %v2820_v22 = vpop.f32.mrb[22].mxu0 }
 0x581   : > { %v4979_v28 = vadd.f32 %v2934_v34, %v2820_v22  ;;  %v4603_v41 = vpop.f32.mrb[23].mxu0 }
 0x582   : > { %v3039_v41 = vsub.f32 %v6573_v54, %v3038_v32 }
 0x583   : > { %5304 = vtanh.f32 %v4979_v28 }
 0x584   : > { %v2826_v17 = vpop.f32.mrb[24].mxu0 }
 0x585   : > { %v4980_v44 = vadd.f32 %v2940_v57, %v2826_v17  ;;  %v4606_v37 = vpop.f32.mrb[25].mxu0 }
 0x587   : > { %5306 = vtanh.f32 %v4980_v44 }
 0x588   : > { %v2832_v13 = vpop.f32.mrb[26].mxu0  ;;  %5308 = vtanh.f32 %v4978_v38 }
 0x589   : > { %v4981_v50 = vadd.f32 %v2946_v58, %v2832_v13  ;;  %v4609_v60 = vpop.f32.mrb[27].mxu0 }
 0x58c   : > { %v2910_v14 = vpop.f32.mrb[14].mxu0 }
 0x58d   : > { %v5305_v30 = vpop.eup %5304  ;;  %5310 = vtanh.f32 %v2910_v14  ;;  %v4626_v10 = vpop.f32.mrb[15].mxu0  ;;  %v3040_v14 = vand.u32 4294901760, %v3039_v41 }
 0x58e   : > { %v2977_v36 = vand.u32 4294901760, %v5305_v30 }
 0x590   : > { %v2916_v45 = vpop.f32.mrb[16].mxu0  ;;  %v6552_v51 = vsub.f32 %v5305_v30, %v2977_v36 }
 0x591   : > { %v5307_v21 = vpop.eup %5306  ;;  %5312 = vtanh.f32 %v2916_v45  ;;  %v4629_v2 = vpop.f32.mrb[17].mxu0 }
 0x592   : > { %v2980_v39 = vand.u32 4294901760, %v5307_v21  ;;  %v3077_v46 = vand.u32 4294901760, %v6552_v51  ;;  %v5309_v19 = vpop.eup %5308 }
 0x593   : > { %v2974_v11 = vand.u32 4294901760, %v5309_v19 }
 0x594   : > { %v2922_v29 = vpop.f32.mrb[18].mxu0  ;;  %v6558_v16 = vpack.c.bf16 %v2980_v39, %v2977_v36  ;;  %v6560_v62 = vsub.f32 %v5307_v21, %v2980_v39  ;;  %v3078_v18 = vsub.f32 %v6552_v51, %v3077_v46 }
 0x595   : > { %5314 = vtanh.f32 %v2922_v29  ;;  %v4632_v4 = vpop.f32.mrb[19].mxu0  ;;  %v3069_v31 = vsub.f32 %v5309_v19, %v2974_v11 }
 0x596   : > { %v3084_v35 = vand.u32 4294901760, %v6560_v62  ;;  %v4934_v40 = vpack.c.bf16 %v6560_v62, %v6552_v51  ;;  %5316 = vtanh.f32 %v4981_v50  ;;  %v3079_v42 = vand.u32 4294901760, %v3078_v18 }
 0x597   : > { %v5311_v3 = vpop.eup %5310  ;;  %v3070_v8 = vand.u32 4294901760, %v3069_v31 }
 0x598   : > { %v2965_v20 = vand.u32 4294901760, %v5311_v3  ;;  %v3085_v26 = vsub.f32 %v6560_v62, %v3084_v35  ;;  %v6568_v24 = vpack.c.bf16 %v3084_v35, %v3077_v46 }
 0x599   : > { %v3071_v5 = vsub.f32 %v3069_v31, %v3070_v8 }
 0x59a   : > { %v3048_v0 = vsub.f32 %v5311_v3, %v2965_v20  ;;  %v3086_v43 = vand.u32 4294901760, %v3085_v26 }
 0x59b   : > { %v5313_v47 = vpop.eup %5312  ;;  %v3072_v60 = vand.u32 4294901760, %v3071_v5 }
 0x59c   : > { %v2968_v25 = vand.u32 4294901760, %v5313_v47  ;;  %v3049_v48 = vand.u32 4294901760, %v3048_v0  ;;  %v4925_v33 = vpack.c.bf16 %v3086_v43, %v3079_v42 }
 0x59e   : > { %v6575_v7 = vpack.c.bf16 %v2968_v25, %v2965_v20  ;;  %v3055_v55 = vsub.f32 %v5313_v47, %v2968_v25  ;;  %v3050_v1 = vsub.f32 %v3048_v0, %v3049_v48 }
 0x59f   : > { %v5315_v61 = vpop.eup %5314 }
 0x5a0   : > { %4911 = vmatpush3.bf16.msra.mxu1 %v6575_v7  ;;  %v2971_v9 = vand.u32 4294901760, %v5315_v61  ;;  %v3056_v23 = vand.u32 4294901760, %v3055_v55  ;;  %v4928_v59 = vpack.c.bf16 %v3055_v55, %v3048_v0  ;;  %v5317_v34 = vpop.eup %5316  ;;  %v3051_v6 = vand.u32 4294901760, %v3050_v1 }
 0x5a1   : > { %4912 = vmatprep.subr.bf16.mxu1 %v5433_v12  ;;  %v2962_v28 = vsel %vm522_vm2, %v5317_v34, 0 }
 0x5a2   : > { %v6580_v52 = vpack.c.bf16 %v2974_v11, %v2971_v9  ;;  %v3062_v57 = vsub.f32 %v5315_v61, %v2971_v9  ;;  %v3057_v63 = vsub.f32 %v3055_v55, %v3056_v23  ;;  %v4946_v58 = vpack.c.bf16 %v3056_v23, %v3049_v48 }
 0x5a3   : > { %v2983_v13 = vand.u32 4294901760, %v2962_v28 }
 0x5a4   : > { %4914 = vmatpush3.bf16.msra.mxu1 %v6580_v52  ;;  %v3058_v38 = vand.u32 4294901760, %v3057_v63  ;;  %v3063_v56 = vand.u32 4294901760, %v3062_v57  ;;  %v4931_v22 = vpack.c.bf16 %v3069_v31, %v3062_v57 }
 0x5a5   : > { %4915 = vmatprep.subr.bf16.mxu1 %v5433_v12  ;;  %v3090_v10 = vsub.f32 %v2962_v28, %v2983_v13 }
 0x5a6   : > { %v4919_v17 = vpack.c.bf16 %v3058_v38, %v3051_v6  ;;  %v3064_v44 = vsub.f32 %v3062_v57, %v3063_v56  ;;  %v4949_v37 = vpack.c.bf16 %v3070_v8, %v3063_v56 }
 0x5a7   : > { %v3091_v36 = vand.u32 4294901760, %v3090_v10 }
 0x5a8   : > { %4917 = vmatpush3.bf16.msra.mxu1 %v6558_v16  ;;  %v3065_v50 = vand.u32 4294901760, %v3064_v44 }
 0x5a9   : > { %4657 = vmatprep.subr.mxu1 %v5435_v15  ;;  %v3092_v45 = vsub.f32 %v3090_v10, %v3091_v36 }
 0x5aa   : > { %v4922_v30 = vpack.c.bf16 %v3072_v60, %v3065_v50 }
 0x5ab   : > { %v3093_v21 = vand.u32 4294901760, %v3092_v45 }
 0x5ac   : > { %4658 = vmatpush3.msra.mxu1 %v2983_v13 }
 0x5ad   : > { %4918 = vmatprep.subr.bf16.mxu1 %v5433_v12  ;;  %4660 = vmatmul.mubr.f32.vlgmr.msra.gmra.mrb[36].mxu1 %v3040_v14 }
 0x5ae   : > { %4920 = vmatpush3.bf16.msra.mxu1 %v4919_v17  ;;  %4676 = vmatprep.mubr.msk.f32.mxu1 %vm5434_vm0, %v5435_v15 }
 0x5af   : > { %4921 = vmatprep.subr.bf16.mxu1 %v5433_v12 }
 0x5b2   : > { %4923 = vmatpush3.bf16.msra.mxu1 %v4922_v30 }
 0x5b3   : > { %4924 = vmatprep.subr.bf16.mxu1 %v5433_v12 }
 0x5b6   : > { %4926 = vmatpush3.bf16.msra.mxu1 %v4925_v33 }
 0x5b7   : > { %4674 = vmatprep.subr.mxu1 %v5435_v15 }
 0x5ba   : > { %4675 = vmatpush3.msra.mxu1 %v3093_v21 }
 0x5bb   : > { %4927 = vmatprep.subr.bf16.mxu1 %v5433_v12  ;;  %4677 = vmatmul.mubr.f32.vlgmr.msra.gmra.mrb[36].mxu1 %v6570_v27 }
 0x5bc   : > { %4929 = vmatpush3.bf16.msra.mxu1 %v4928_v59  ;;  %4693 = vmatprep.mubr.msk.f32.mxu1 %vm5434_vm0, %v5435_v15 }
 0x5bd   : > { %4930 = vmatprep.subr.bf16.mxu1 %v5433_v12 }
 0x5c0   : > { %4932 = vmatpush3.bf16.msra.mxu1 %v4931_v22 }
 0x5c1   : > { %4933 = vmatprep.subr.bf16.mxu1 %v5433_v12 }
 0x5c4   : > { %4935 = vmatpush3.bf16.msra.mxu1 %v4934_v40 }
 0x5c5   : > { %4691 = vmatprep.subr.mxu1 %v5435_v15 }
 0x5c8   : > { %4692 = vmatpush3.msra.mxu1 %v3090_v10 }
 0x5c9   : > { %4936 = vmatprep.subr.bf16.mxu1 %v5433_v12  ;;  %4694 = vmatmul.mubr.f32.vlgmr.msra.gmra.mrb[36].mxu1 %v6573_v54 }
 0x5ca   : > { %4938 = vmatpush3.bf16.msra.mxu1 %v6575_v7  ;;  %4710 = vmatprep.mubr.msk.f32.mxu1 %vm5434_vm0, %v5435_v15 }
 0x5cb   : > { %4939 = vmatprep.subr.bf16.mxu1 %v5433_v12 }
 0x5ce   : > { %4941 = vmatpush3.bf16.msra.mxu1 %v6580_v52 }
 0x5cf   : > { %4942 = vmatprep.subr.bf16.mxu1 %v5433_v12 }
 0x5d2   : > { %4944 = vmatpush3.bf16.msra.mxu1 %v6558_v16 }
 0x5d3   : > { %4708 = vmatprep.subr.mxu1 %v5435_v15 }
 0x5d6   : > { %4709 = vmatpush3.msra.mxu1 %v2983_v13 }
 0x5d7   : > { %4945 = vmatprep.subr.bf16.mxu1 %v5433_v12  ;;  %4711 = vmatmul.mubr.f32.vlgmr.msra.gmra.mrb[36].mxu1 %v3038_v32 }
 0x5d8   : > { %4947 = vmatpush3.bf16.msra.mxu1 %v4946_v58  ;;  %4727 = vmatprep.mubr.msk.f32.mxu1 %vm5434_vm0, %v5435_v15 }
 0x5d9   : > { %4948 = vmatprep.subr.bf16.mxu1 %v5433_v12 }
 0x5dc   : > { %4950 = vmatpush3.bf16.msra.mxu1 %v4949_v37 }
 0x5dd   : > { %4951 = vmatprep.subr.bf16.mxu1 %v5433_v12 }
 0x5e0   : > { %4953 = vmatpush3.bf16.msra.mxu1 %v6568_v24 }
 0x5e1   : > { %4725 = vmatprep.subr.mxu1 %v5435_v15 }
 0x5e4   : > { %4726 = vmatpush3.msra.mxu1 %v3091_v36 }
 0x5e5   : > { %4954 = vmatprep.subr.bf16.mxu1 %v5433_v12  ;;  %4728 = vmatmul.mubr.f32.vlgmr.msra.gmra.mrb[36].mxu1 %v6570_v27 }
 0x5e6   : > { %4956 = vmatpush3.bf16.msra.mxu1 %v6575_v7  ;;  %4744 = vmatprep.mubr.msk.f32.mxu1 %vm5434_vm0, %v5435_v15 }
 0x5e7   : > { %4957 = vmatprep.subr.bf16.mxu1 %v5433_v12 }
 0x5ea   : > { %4959 = vmatpush3.bf16.msra.mxu1 %v6580_v52 }
 0x5eb   : > { %4960 = vmatprep.subr.bf16.mxu1 %v5433_v12 }
 0x5ee   : > { %4962 = vmatpush3.bf16.msra.mxu1 %v6558_v16 }
 0x5ef   : > { %4742 = vmatprep.subr.mxu1 %v5435_v15 }
 0x5f2   : > { %4743 = vmatpush3.msra.mxu1 %v2983_v13 }
 0x5f3   : > { %4745 = vmatmul.mubr.f32.vlgmr.msra.gmra.mrb[36].mxu1 %v6570_v27 }
 0x6c6   : > { %v3484_v51 = vpop.f32.mrb[36].mxu1 }
 0x6c7   : > { %5318 = vtanh.f32 %v3484_v51  ;;  %v4746_v2 = vpop.f32.mrb[37].mxu1 }
 0x6d1   : > { %v5319_v39 = vpop.eup %5318 }
 0x6d2   : > { %v3490_v46 = vsel %vm3489_vm3, %v5319_v39, -inf }
 0x6d3   : > { %v3491_v53 = vrot.slane %v3490_v46, 4 }
 0x6d5   : > { %v3492_v19 = vmax.f32 %v3490_v46, %v3491_v53 }
 0x6d7   : > { %v3493_v29 = vrot.slane %v3492_v19, 2 }
 0x6d9   : > { %v3494_v62 = vmax.f32 %v3492_v19, %v3493_v29 }
 0x6db   : > { %v3495_v4 = vrot.slane %v3494_v62, 1 }
 0x6dd   : > { %v3496_v12 = vmax.f32 %v3494_v62, %v3495_v4 }
 0x6df   : > { %v3497_v49 = vsub.f32 %v5319_v39, %v3496_v12 }
 0x6e1   : > { %v3498_v16 = vmul.f32 1.442695, %v3497_v49 }
 0x6e3   : > { %5320 = vpow2.f32 %v3498_v16 }
 0x6ed   : > { %v5321_v18 = vpop.eup %5320 }
 0x6ee   : > { %v3500_v35 = vsel %vm3489_vm3, %v5321_v18, 0.0 }
 0x6ef   : > { %v3501_v40 = vrot.slane %v3500_v35, 4 }
 0x6f1   : > { %v3502_v3 = vadd.f32 %v3501_v40, %v3500_v35 }
 0x6f3   : > { %v3503_v11 = vrot.slane %v3502_v3, 2 }
 0x6f5   : > { %v3504_v20 = vadd.f32 %v3503_v11, %v3502_v3 }
 0x6f7   : > { %v3505_v26 = vrot.slane %v3504_v20, 1 }
 0x6f9   : > { %v3506_v24 = vadd.f32 %v3505_v26, %v3504_v20 }
 0x6fb   : > { %5322 = vrcp.f32 %v3506_v24 }
 0x705   : > { %v5323_v27 = vpop.eup %5322 }
 0x706   : > { %v3508_v0 = vmul.f32 %v5323_v27, %v5321_v18 }
 0x708   : > { %v3509_v42 = vmax.f32 %v3508_v0, 0.0 }
 0x70a   : > { %v3510_v43 = vmin.f32 %v3509_v42, 0.6 }
 0x70c   : > { %v3511_v47 = vsub.f32 %v3508_v0, %v3510_v43  ;;  %vm3519_vm4 = vcmp.ne.f32.partialorder %v3510_v43, 0.6 }
 0x70d   : > { %v3520_v31 = vsel %vm3519_vm4, %v3510_v43, 0.0 }
 0x70e   : > { %v3512_v25 = vsel %vm3489_vm3, %v3511_v47, 0.0  ;;  %v3521_v48 = vsel %vm3489_vm3, %v3520_v31, 0.0 }
 0x70f   : > { %v3513_v33 = vrot.slane %v3512_v25, 4  ;;  %v3522_v54 = vrot.slane %v3521_v48, 4 }
 0x711   : > { %v3523_v7 = vadd.f32 %v3522_v54, %v3521_v48  ;;  %v3514_v55 = vadd.f32 %v3513_v33, %v3512_v25  ;;  %v3711_v33 = vld [vmem:[%s243_s12] ss:$0 sm:$0xff] }
 0x713   : > { %v3524_v61 = vrot.slane %v3523_v7, 2  ;;  %v3515_v9 = vrot.slane %v3514_v55, 2 }
 0x715   : > { %v3525_v8 = vadd.f32 %v3524_v61, %v3523_v7  ;;  %v3516_v59 = vadd.f32 %v3515_v9, %v3514_v55 }
 0x717   : > { %v3526_v1 = vrot.slane %v3525_v8, 1  ;;  %v3517_v34 = vrot.slane %v3516_v59, 1 }
 0x719   : > { %v3527_v23 = vadd.f32 %v3526_v1, %v3525_v8  ;;  %v3518_v52 = vadd.f32 %v3517_v34, %v3516_v59 }
 0x71b   : > { %vm3528_vm5 = vcmp.eq.f32.partialorder %v3527_v23, 0.0  ;;  %v3530_v57 = vmul.f32 %v3518_v52, %v3510_v43 }
 0x71c   : > { %v3529_v32 = vsel %vm3528_vm5, 1.0, %v3527_v23 }
 0x71d   : > { %5324 = vrcp.f32 %v3529_v32 }
 0x727   : > { %v5325_v63 = vpop.eup %5324 }
 0x728   : > { %v3532_v58 = vmul.f32 %v5325_v63, %v3530_v57 }
 0x72a   : > { %v3533_v5 = vadd.f32 %v3532_v58, %v3510_v43 }
 0x72c   : > { %v3534_v6 = vsel %vm3519_vm4, %v3533_v5, %v3510_v43 }
 0x72d   : > { %vm3540_vm6 = vcmp.gt.f32.partialorder %v3534_v6, 0.6  ;;  %v3550_v44 = vmax.f32 %v3534_v6, 0.0 }
 0x72e   : > { %v3541_v38 = vsel %vm3540_vm6, 1.0, %v5435_v15 }
 0x72f   : > { %v3542_v56 = vsel %vm3489_vm3, %v3541_v38, -inf  ;;  %v3551_v50 = vmin.f32 %v3550_v44, 0.6 }
 0x730   : > { %v3543_v22 = vrot.slane %v3542_v56, 4 }
 0x732   : > { %v3544_v28 = vmax.f32 %v3542_v56, %v3543_v22 }
 0x734   : > { %v3545_v41 = vrot.slane %v3544_v28, 2 }
 0x736   : > { %v3546_v17 = vmax.f32 %v3544_v28, %v3545_v41 }
 0x738   : > { %v3547_v37 = vrot.slane %v3546_v17, 1 }
 0x73a   : > { %v3548_v13 = vmax.f32 %v3546_v17, %v3547_v37 }
 0x73c   : > { %vm3549_vm7 = vcmp.gt.f32.partialorder %v3548_v13, 0.5 }
 0x73d   : > { %v3554_v60 = vsel %vm3549_vm7, %v3551_v50, %v3534_v6 }
 0x73e   : > { %v3555_v14 = vsub.f32 %v3534_v6, %v3554_v60  ;;  %vm3563_vm8 = vcmp.ne.f32.partialorder %v3554_v60, 0.6 }
 0x73f   : > { %v3564_v30 = vsel %vm3563_vm8, %v3554_v60, 0.0 }
 0x740   : > { %v3556_v10 = vsel %vm3489_vm3, %v3555_v14, 0.0  ;;  %v3565_v36 = vsel %vm3489_vm3, %v3564_v30, 0.0 }
 0x741   : > { %v3557_v45 = vrot.slane %v3556_v10, 4  ;;  %v3566_v21 = vrot.slane %v3565_v36, 4 }
 0x743   : > { %v3567_v51 = vadd.f32 %v3566_v21, %v3565_v36  ;;  %v3558_v2 = vadd.f32 %v3557_v45, %v3556_v10 }
 0x745   : > { %v3568_v39 = vrot.slane %v3567_v51, 2  ;;  %v3559_v53 = vrot.slane %v3558_v2, 2 }
 0x747   : > { %v3569_v46 = vadd.f32 %v3568_v39, %v3567_v51  ;;  %v3560_v62 = vadd.f32 %v3559_v53, %v3558_v2 }
 0x749   : > { %v3570_v19 = vrot.slane %v3569_v46, 1  ;;  %v3561_v12 = vrot.slane %v3560_v62, 1 }
 0x74b   : > { %v3571_v29 = vadd.f32 %v3570_v19, %v3569_v46  ;;  %v3562_v49 = vadd.f32 %v3561_v12, %v3560_v62 }
 0x74d   : > { %vm3572_vm9 = vcmp.eq.f32.partialorder %v3571_v29, 0.0  ;;  %v3574_v16 = vmul.f32 %v3562_v49, %v3554_v60 }
 0x74e   : > { %v3573_v4 = vsel %vm3572_vm9, 1.0, %v3571_v29 }
 0x74f   : > { %5326 = vrcp.f32 %v3573_v4 }
 0x759   : > { %v5327_v18 = vpop.eup %5326 }
 0x75a   : > { %v3576_v35 = vmul.f32 %v5327_v18, %v3574_v16 }
 0x75c   : > { %v3577_v40 = vadd.f32 %v3576_v35, %v3554_v60 }
 0x75e   : > { %v3578_v3 = vsel %vm3563_vm8, %v3577_v40, %v3554_v60 }
 0x75f   : > { %v3579_v11 = vsel %vm3549_vm7, %v3578_v3, %v3534_v6 }
 0x760   : > { %vm3580_vm10 = vcmp.gt.f32.partialorder %v3579_v11, 0.6  ;;  %v3591_v47 = vmax.f32 %v3579_v11, 0.0 }
 0x761   : > { %v3581_v20 = vsel %vm3580_vm10, 1.0, %v5435_v15  ;;  %v5328_v15 = vld [vmem:[%s5596_s7] sm:$0x1f]  ;;  %s5363_s7 = scalar_lea.vmem %s5362_s8, 32 }
 0x762   : > { %v3582_v26 = vsel %vm3489_vm3, %v3581_v20, -inf  ;;  %v3592_v48 = vmin.f32 %v3591_v47, 0.6  ;;  %v3604_v54 = vadd.f32 1.0, %v5328_v15  ;;  %p5365_p3 = scmp.lt.s32.totalorder %s5363_s7, %s5357_s6 }
 0x763   : > { %v3583_v24 = vrot.slane %v3582_v26, 4 }
 0x764   : > { %p5366_p4 = por %p5365_p3, %p5364_p2 }
 0x765   : > { %v3584_v27 = vmax.f32 %v3582_v26, %v3583_v24 }
 0x766   : > { %p5367_p7 = pnand %p5366_p4, %p5360_p12 }
 0x767   : > { %v3585_v0 = vrot.slane %v3584_v27, 2 }
 0x769   : > { %v3586_v42 = vmax.f32 %v3584_v27, %v3585_v0 }
 0x76b   : > { %v3587_v43 = vrot.slane %v3586_v42, 1 }
 0x76d   : > { %v3588_v31 = vmax.f32 %v3586_v42, %v3587_v43 }
 0x76f   : > { %v3589_v25 = vmul.f32 %v3588_v31, %v3548_v13 }
 0x771   : > { %vm3590_vm11 = vcmp.gt.f32.partialorder %v3589_v25, 0.5 }
 0x772   : > { %v3595_v7 = vsel %vm3590_vm11, %v3592_v48, %v3579_v11 }
 0x773   : > { %v3603_v55 = vmul.f32 %v3711_v33, %v3595_v7 }
 0x775   : > { %v3605_v61 = vmul.f32 %v3604_v54, %v3603_v55 }
 0x777   : > { %v3606_v8 = vmul.f32 1.01, %v3605_v61 }
 0x779   : > { %v3607_v9 = vsel %vm3489_vm3, %v3606_v8, 0.0 }
 0x77a   : > { %v3608_v1 = vrot.slane %v3607_v9, 4 }
 0x77c   : > { %v3609_v23 = vadd.f32 %v3608_v1, %v3607_v9 }
 0x77e   : > { %v3610_v59 = vrot.slane %v3609_v23, 2 }
 0x780   : > { %v3611_v32 = vadd.f32 %v3610_v59, %v3609_v23 }
 0x782   : > { %v3612_v34 = vrot.slane %v3611_v32, 1 }
 0x784   : > { %v3613_v52 = vadd.f32 %v3612_v34, %v3611_v32 }
 0x786   : > { %3614 = vst [vmem:[%s240_s15] sm:$0x1] %v3613_v52 }
 0x787   : > { %5370 = shalt.err (!%p5367_p7)
}
 0x788   : > { %s5371_s30 = scalar_lea.hbm %s6659_s25, 16  ;;  %s5375_s11 = scalar_lea.hbm %s6706_s5, 32 }
 0x789   : > { %p5372_p8 = scmp.ne.s32.totalorder %s6659_s25, %s5371_s30  ;;  %p5376_p1 = scmp.lt.u32.totalorder %s6659_s25, %s6706_s5 }
 0x78a   : > { %p5377_p0 = scmp.lt.u32.totalorder %s5375_s11, %s5371_s30  ;;  %p5379_p6 = scmp.lt.u32.totalorder %s5371_s30, %s6659_s25 }
 0x78b   : > { %p5373_p11 = pnand %p5372_p8, %p6717_p9 }
 0x78c   : > { %p5378_p5 = por %p5377_p0, %p5376_p1 }
 0x78d   : > { %p5374_p13 = pneg %p5373_p11 }
 0x78e   : > { %p5380_p10 = por %p5379_p6, %p5378_p5 }
 0x790   : > { %p5381_p12 = pnand %p5380_p10, %p5374_p13 }
 0x792   : > { %5384 = shalt.err (!%p5381_p12)
}
 0x793   : > { %5184 = dma.vmem_to_hbm [thread:$0]  (%p6717_p9), %s6661_s16, 16, %s6659_s25, %s3616_s26  }
 0x794 PF: > { %p5196_p2 = scmp.ge.s32.totalorder %s5423_s21, 2  ;;  %s3640_s14 = sand.u32 1, %s5411_s18  }
 0x795   : > { %p6718_p3 = scmp.ne.s32.totalorder %s6711_s29, 0  ;;  %s3641_s15 = scalar_lea.sflag [#allocation4], %s3640_s14 }
 0x797   : > { %p5191_p4 = pnand %p5196_p2, %p6718_p3 }
 0x799   : > { %5406 = dma.done.wait (!%p5191_p4), %s3641_s15, 16  }
 0x79a   : > { %5408 = vsyncadd (!%p5191_p4), %s3641_s15, 4294967280  ;;  %p16_p7 = scmp.ge.s32.totalorder %s5492_s24, 4   ;;  %s6719_s18 = smov %s5415_s19 }
 0x79b   : > { %s6720_s19 = smov %s5419_s20  ;;  %s6721_s20 = smov %s5503_s27 }
 0x79c   : > { %s6722_s21 = smov %s5492_s24  ;;  %18 = sbr.rel (!%p16_p7) target bundleno = 4 (0x4), region = 85 }
 0x7a3   :  { %3645 = vsyncpa [#allocation3], 1 }
 0x7a4   :  { %3647 = vsyncpa [#allocation3 + $0x1], 1 }
 0x7a5   :  { %3648 = vsyncpa [#allocation4], 1 }
 0x7a6   :  { %3650 = vsyncpa [#allocation4 + $0x1], 1 }

</bundles_post_ra>
